<compile_context>
chip_gen: v7x
topology: tpu7x:2x2x1
jax: 0.10.0
libtpu: 0.0.40
codegen_flags: <defaults>
</compile_context>

<pallas_src>
import functools

import jax
import jax.numpy as jnp
from jax.experimental import pallas as pl
from jax.experimental.pallas import tpu as pltpu


# ------------------------------ fused Pallas kernel ---------------------------


def p2p_kernel(x_ref, g_ref, border_ref, wi_ref, bi_ref, mv_ref,
               wc_ref, bc_ref, wf_ref, bf_ref,
               pix_ref, grp_ref, ci_ref, y_ref, *, width):
    """Fused selector + classifier for Bb images folded onto the lane axis.

    x_ref  : (Bb, C_in, N)  input images, channels x flattened spatial
    g_ref  : (Bb, 1, N)     superpixel ids (int32), values in [0, G)
    border : (4, N)         conv-border validity rows [top, bottom, left, right]
    wi_ref : (P1, 1)        importance-conv weights (column form, VPU MAC); P1 = C_in*9
    bi_ref : (1, 1)         importance-conv bias
    mv_ref : (C_in, 1)      min_vals (normalized zero pixel) per channel
    wc_ref : (F, P1+9)      [classifier conv weights | W9 = min_vals-folded columns]
    bc_ref : (F, 1)         classifier conv bias
    wf_ref : (F, C)         classifier fc weights
    bf_ref : (1, C)         classifier fc bias
    pix_ref: (Bb, 1, N)     out: per-pixel selection probabilities
    grp_ref: (Bb*G, 1)      out: per-group selection probabilities
    ci_ref : (Bb, C_in, N)  out: masked classifier input (MC samples identical)
    y_ref  : (Bb, 1, C)     out: log(mean_k softmax) == log(softmax) in validation
    """
    Bb, C_in, N = x_ref.shape
    GT = grp_ref.shape[0]            # Bb * G (block-local group count)
    G = GT // Bb
    L = Bb * N                       # lane extent of the fused batch block
    W = width

    # ---- fold the Bb images onto the lane axis (cheap in-VMEM lane concats) ----
    x3 = jnp.concatenate([x_ref[b] for b in range(Bb)], axis=1)              # (C_in, L)
    g_row = jnp.concatenate([g_ref[b] + b * G for b in range(Bb)], axis=1)   # (1, L)
    border = jnp.concatenate([border_ref[...]] * Bb, axis=1)                 # (4, L)
    ones_row = jnp.ones((1, L), jnp.float32)
    row_m = [border[0:1], ones_row, border[1:2]]     # dy = 0, 1, 2 validity
    col_m = [border[2:3], ones_row, border[3:4]]     # dx = 0, 1, 2 validity

    # ---- rebuild the 9 conv shifts in VMEM with pltpu.roll (XLU) + border masks ----
    # A roll that crosses an image border (incl. batch boundaries inside the block or the
    # global wrap-around) lands exactly on lanes the border mask zeroes => exact zero pad.
    shifted = []        # per shift: border-masked shifted x, (C_in, L)
    shift_masks = []    # per shift: validity, (1, L)
    offsets = []
    for dy in range(3):
        for dx in range(3):
            off = (dy - 1) * W + (dx - 1)
            m = row_m[dy] * col_m[dx]
            xs = x3 if off == 0 else pltpu.roll(x3, (-off) % L, 1)
            shifted.append(xs * m)
            shift_masks.append(m)
            offsets.append(off)
    patches = jnp.concatenate(shifted, axis=0)        # (P1, L), row = s*C_in + c

    # ---- importance predictor (3x3 conv, C_in -> 1) as a VPU MAC + sublane reduce ----
    logits = jnp.sum(wi_ref[...] * patches, axis=0, keepdims=True) + bi_ref[0, 0]  # (1,L)
    pix = jax.nn.sigmoid(logits)

    # ---- scatter-mean over superpixel groups (ONE one-hot, reused for the gather) ----
    gid = jax.lax.broadcasted_iota(jnp.int32, (GT, L), 0)
    onehot = (gid == g_row).astype(jnp.float32)                     # (GT, L)
    counts = jnp.sum(onehot, axis=1, keepdims=True)                 # (GT, 1)
    gsum = jnp.sum(onehot * logits, axis=1, keepdims=True)          # (GT, 1)
    mu = jnp.where(counts > 0, gsum / jnp.maximum(counts, 1.0), 0.0)
    gprobs = jax.nn.sigmoid(mu)                                     # (GT, 1)
    grp_ref[...] = gprobs

    # validation: hard threshold; all num_monte_carlo samples are identical
    hard = (gprobs > 0.5).astype(jnp.float32)                       # (GT, 1)
    m_pix = jnp.sum(onehot * hard, axis=0, keepdims=True)           # (1, L) pixel mask

    # ---- masked classifier input (stored once; MC samples identical) ----
    ci = x3 * m_pix + mv_ref[...] * (1.0 - m_pix)                   # (C_in, L)

    # ---- 3x3-conv patches of ci rebuilt from shifted x + rolled mask (no (P1,L) tiles):
    #   ci_patch[s*C_in+c] = shifted_x[s][c] * roll(m, off_s)       (x term)
    #   vm[s]              = mask_s * (1 - roll(m, off_s))          (min_vals term, via W9)
    masked_parts = []
    vm_rows = []
    for s, off in enumerate(offsets):
        mr = m_pix if off == 0 else pltpu.roll(m_pix, (-off) % L, 1)   # (1, L)
        masked_parts.append(shifted[s] * mr)                           # (C_in, L)
        vm_rows.append(shift_masks[s] * (1.0 - mr))                    # (1, L)
    p_full = jnp.concatenate(masked_parts + vm_rows, axis=0)           # (P1+9, L)

    # classifier conv (C_in -> F) + folded min_vals term: ONE MXU matmul, lane-dense out
    h = jnp.dot(wc_ref[...], p_full, preferred_element_type=jnp.float32) + bc_ref[...]
    h = jnp.maximum(h, 0.0)                                             # (F, L)

    # ---- per-image head: GAP -> Linear(F -> C) -> log(softmax + 1e-6) ----
    for b in range(Bb):
        lo, hi = b * N, (b + 1) * N
        pooled = jnp.mean(h[:, lo:hi], axis=1, keepdims=True)                    # (F, 1)
        cl = jnp.sum(wf_ref[...] * pooled, axis=0, keepdims=True) + bf_ref[...]  # (1, C)
        mx = jnp.max(cl, axis=1, keepdims=True)
        e = jnp.exp(cl - mx)
        probs = e / jnp.sum(e, axis=1, keepdims=True)
        y_ref[b] = jnp.log(probs + 1e-6)                                          # (1, C)
        pix_ref[b] = pix[:, lo:hi]                                                # (1, N)
        ci_ref[b] = ci[:, lo:hi]                                                  # (C_in,N)


# ------------------------------- glue / wrapper --------------------------------


@functools.partial(jax.jit, static_argnames=("n_segments", "num_mc", "block_b",
                                              "expand_monte_carlo"))
def p2p_forward(x, groups, params, *, n_segments, num_mc, block_b=2,
                expand_monte_carlo=True):
    """P2P forward (validation path).  x: (B, 3, H, W) NCHW, groups: (B, H, W) int32."""
    B, C_in, H, W = x.shape
    N = H * W
    G = n_segments
    P1 = C_in * 9
    F = params["w_conv"].shape[0]
    C = params["w_fc"].shape[1]
    Bb = min(block_b, B)
    assert B % Bb == 0, "batch must be divisible by block_b"
    nblk = B // Bb

    x_flat = x.reshape(B, C_in, N)
    g_flat = groups.reshape(B, 1, N).astype(jnp.int32)

    # 3x3-conv border-validity rows (top, bottom, left, right); shared by all images.
    hh = jnp.arange(H)[:, None]
    ww = jnp.arange(W)[None, :]
    top = jnp.broadcast_to(hh >= 1, (H, W))
    bot = jnp.broadcast_to(hh <= H - 2, (H, W))
    left = jnp.broadcast_to(ww >= 1, (H, W))
    right = jnp.broadcast_to(ww <= W - 2, (H, W))
    border = jnp.stack([top, bot, left, right]).reshape(4, N).astype(jnp.float32)

    mv = params["min_vals"]                                  # (C_in, 1)
    wi_col = jnp.transpose(params["w_imp"])                  # (P1, 1)
    # fold min_vals into 9 extra classifier columns: W9[f, s] = sum_c wc[f, s, c] * mv[c]
    w9 = jnp.einsum("fsc,c->fs", params["w_conv"].reshape(F, 9, C_in), mv[:, 0])
    wc_aug = jnp.concatenate([params["w_conv"], w9], axis=1)  # (F, P1 + 9)

    cost = pl.CostEstimate(
        flops=int(B * (2 * P1 * N + 2 * (P1 + 9) * F * N + 8 * G * N + F * N + 2 * F * C)),
        transcendentals=int(B * (N + G + C)),
        bytes_accessed=int(4 * (B * (2 * (C_in + 1) * N + G + C)
                                + P1 + 1 + C_in + F * (P1 + 9) + F + F * C + C + 4 * N)),
    )

    kernel = functools.partial(p2p_kernel, width=W)

    pix, grp, ci, y = pl.pallas_call(
        kernel,
        out_shape=(
            jax.ShapeDtypeStruct((B, 1, N), jnp.float32),
            jax.ShapeDtypeStruct((B * G, 1), jnp.float32),
            jax.ShapeDtypeStruct((B, C_in, N), jnp.float32),
            jax.ShapeDtypeStruct((B, 1, C), jnp.float32),
        ),
        grid_spec=pltpu.PrefetchScalarGridSpec(
            num_scalar_prefetch=0,
            grid=(nblk,),
            in_specs=[
                pl.BlockSpec((Bb, C_in, N), lambda i: (i, 0, 0)),
                pl.BlockSpec((Bb, 1, N), lambda i: (i, 0, 0)),
                pl.BlockSpec((4, N), lambda i: (0, 0)),
                pl.BlockSpec((P1, 1), lambda i: (0, 0)),
                pl.BlockSpec((1, 1), lambda i: (0, 0)),
                pl.BlockSpec((C_in, 1), lambda i: (0, 0)),
                pl.BlockSpec((F, P1 + 9), lambda i: (0, 0)),
                pl.BlockSpec((F, 1), lambda i: (0, 0)),
                pl.BlockSpec((F, C), lambda i: (0, 0)),
                pl.BlockSpec((1, C), lambda i: (0, 0)),
            ],
            out_specs=[
                pl.BlockSpec((Bb, 1, N), lambda i: (i, 0, 0)),
                pl.BlockSpec((Bb * G, 1), lambda i: (i, 0)),
                pl.BlockSpec((Bb, C_in, N), lambda i: (i, 0, 0)),
                pl.BlockSpec((Bb, 1, C), lambda i: (i, 0, 0)),
            ],
        ),
        compiler_params=pltpu.CompilerParams(
            dimension_semantics=("parallel",)),
        cost_estimate=cost,
    )(x_flat, g_flat, border, wi_col, params["b_imp"], mv,
      wc_aug, params["b_conv"], params["w_fc"], params["b_fc"])

    y_pred_logits = y.reshape(B, C)
    groups_probs = grp.reshape(B, G)
    pixel_probs = pix.reshape(B, H, W)
    ci_img = ci.reshape(B, C_in, H, W)
    if expand_monte_carlo:
        # PyTorch layout (B, C_in, H, W, K); MC samples are bit-identical in validation,
        # so the K axis is a broadcast of the single stored copy rather than K stores.
        classifier_input = jnp.broadcast_to(ci_img[..., None], (B, C_in, H, W, num_mc))
    else:
        classifier_input = ci_img
    groups_cov = None  # use_cov=False
    return y_pred_logits, groups_probs, pixel_probs, classifier_input, groups_cov


# ----------------------------------- main --------------------------------------


if __name__ == "__main__":
    # small, module-consistent shapes
    B, C_in, H, W = 4, 3, 16, 16
    G = 8            # n_segments
    K = 4            # num_monte_carlo
    F = 32           # classifier conv channels
    NUM_CLASSES = 10
    P1 = C_in * 9

    key = jax.random.PRNGKey(0)
    k_x, k_wi, k_wc, k_wf = jax.random.split(key, 4)

    x = jax.random.normal(k_x, (B, C_in, H, W), dtype=jnp.float32)

    # deterministic superpixel grid: 8 rectangular groups of 8x4 pixels
    hh = jnp.arange(H)[:, None]
    ww = jnp.arange(W)[None, :]
    groups_2d = (hh // 8) * 4 + (ww // 4)                    # values in [0, 8)
    groups = jnp.broadcast_to(groups_2d, (B, H, W)).astype(jnp.int32)

    # min_vals = normalization transform applied to a zero pixel: (0 - mean) / std
    mean = jnp.array([0.485, 0.456, 0.406], dtype=jnp.float32)
    std = jnp.array([0.229, 0.224, 0.225], dtype=jnp.float32)
    min_vals = (-(mean / std)).reshape(C_in, 1)

    params = dict(
        # importance predictor: 3x3 conv, 3 -> 1 channel; flat column order s*C_in + c
        w_imp=(jax.random.normal(k_wi, (1, P1), jnp.float32) / jnp.sqrt(float(P1))),
        b_imp=jnp.full((1, 1), 0.1, dtype=jnp.float32),
        # classifier: 3x3 conv (3 -> F), ReLU, GAP, Linear(F -> NUM_CLASSES)
        w_conv=(jax.random.normal(k_wc, (F, P1), jnp.float32) / jnp.sqrt(float(P1))),
        b_conv=jnp.zeros((F, 1), dtype=jnp.float32),
        w_fc=(jax.random.normal(k_wf, (F, NUM_CLASSES), jnp.float32)
              / jnp.sqrt(float(F))),
        b_fc=jnp.zeros((1, NUM_CLASSES), dtype=jnp.float32),
        min_vals=min_vals,
    )

    outs = p2p_forward(x, groups, params, n_segments=G, num_mc=K, block_b=2)
    y_pred_logits, groups_probs, pixel_probs, classifier_input, groups_cov = outs
    jax.block_until_ready((y_pred_logits, groups_probs, pixel_probs, classifier_input))

    assert y_pred_logits.shape == (B, NUM_CLASSES)
    assert groups_probs.shape == (B, G)
    assert pixel_probs.shape == (B, H, W)
    assert classifier_input.shape == (B, C_in, H, W, K)
    # TODO(synk): training-mode paths (RelaxedBernoulli / MultivariateNormal sampling,
    # dynamic thresholds, use_cov) are stochastic torch.distributions code and are not
    # reproduced; this implements the deterministic validation forward.
    print("KERNEL_OK")
</pallas_src>

<mosaic_0001>
module attributes {stable_mosaic.version = 11 : i64} {
  func.func @p2p_kernel(%arg0: i32, %arg1: memref<2x3x256xf32, #tpu.memory_space<vmem>>, %arg2: memref<2x1x256xi32, #tpu.memory_space<vmem>>, %arg3: memref<4x256xf32, #tpu.memory_space<vmem>>, %arg4: memref<27x1xf32, #tpu.memory_space<vmem>>, %arg5: memref<1x1xf32, #tpu.memory_space<vmem>>, %arg6: memref<3x1xf32, #tpu.memory_space<vmem>>, %arg7: memref<32x36xf32, #tpu.memory_space<vmem>>, %arg8: memref<32x1xf32, #tpu.memory_space<vmem>>, %arg9: memref<32x10xf32, #tpu.memory_space<vmem>>, %arg10: memref<1x10xf32, #tpu.memory_space<vmem>>, %arg11: memref<2x1x256xf32, #tpu.memory_space<vmem>>, %arg12: memref<16x1xf32, #tpu.memory_space<vmem>>, %arg13: memref<2x3x256xf32, #tpu.memory_space<vmem>>, %arg14: memref<2x1x10xf32, #tpu.memory_space<vmem>>) attributes {dimension_semantics = [#tpu.dimension_semantics<parallel>], iteration_bounds = array<i64: 2>, scalar_prefetch = 0 : i64, scratch_operands = 0 : i64, tpu.core_type = #tpu.core_type<tc>, window_params = [{transform_indices = @transform_0, window_bounds = array<i64: 2, 3, 256>}, {transform_indices = @transform_1, window_bounds = array<i64: 2, 1, 256>}, {pipeline_mode = #tpu.pipeline_mode<synchronous>, transform_indices = @transform_2, window_bounds = array<i64: 4, 256>}, {pipeline_mode = #tpu.pipeline_mode<synchronous>, transform_indices = @transform_3, window_bounds = array<i64: 27, 1>}, {pipeline_mode = #tpu.pipeline_mode<synchronous>, transform_indices = @transform_4, window_bounds = array<i64: 1, 1>}, {pipeline_mode = #tpu.pipeline_mode<synchronous>, transform_indices = @transform_5, window_bounds = array<i64: 3, 1>}, {pipeline_mode = #tpu.pipeline_mode<synchronous>, transform_indices = @transform_6, window_bounds = array<i64: 32, 36>}, {pipeline_mode = #tpu.pipeline_mode<synchronous>, transform_indices = @transform_7, window_bounds = array<i64: 32, 1>}, {pipeline_mode = #tpu.pipeline_mode<synchronous>, transform_indices = @transform_8, window_bounds = array<i64: 32, 10>}, {pipeline_mode = #tpu.pipeline_mode<synchronous>, transform_indices = @transform_9, window_bounds = array<i64: 1, 10>}, {transform_indices = @transform_10, window_bounds = array<i64: 2, 1, 256>}, {transform_indices = @transform_11, window_bounds = array<i64: 16, 1>}, {transform_indices = @transform_12, window_bounds = array<i64: 2, 3, 256>}, {transform_indices = @transform_13, window_bounds = array<i64: 2, 1, 10>}]} {
    %c0 = arith.constant 0 : index
    %c0_0 = arith.constant 0 : index
    %c0_1 = arith.constant 0 : index
    %0 = vector.load %arg1[%c0, %c0_0, %c0_1] : memref<2x3x256xf32, #tpu.memory_space<vmem>>, vector<1x3x256xf32>
    %1 = vector.shape_cast %0 : vector<1x3x256xf32> to vector<3x256xf32>
    %c1 = arith.constant 1 : index
    %c0_2 = arith.constant 0 : index
    %c0_3 = arith.constant 0 : index
    %2 = vector.load %arg1[%c1, %c0_2, %c0_3] : memref<2x3x256xf32, #tpu.memory_space<vmem>>, vector<1x3x256xf32>
    %3 = vector.shape_cast %2 : vector<1x3x256xf32> to vector<3x256xf32>
    %4 = tpu.concatenate %1, %3 in 1 : vector<3x256xf32>, vector<3x256xf32> -> vector<3x512xf32>
    %c0_4 = arith.constant 0 : index
    %c0_5 = arith.constant 0 : index
    %c0_6 = arith.constant 0 : index
    %5 = vector.load %arg2[%c0_4, %c0_5, %c0_6] : memref<2x1x256xi32, #tpu.memory_space<vmem>>, vector<1x1x256xi32>
    %6 = vector.shape_cast %5 : vector<1x1x256xi32> to vector<1x256xi32>
    %c0_i32 = arith.constant 0 : i32
    %7 = vector.broadcast %c0_i32 : i32 to vector<1x256xi32>
    %8 = arith.addi %6, %7 : vector<1x256xi32>
    %c1_7 = arith.constant 1 : index
    %c0_8 = arith.constant 0 : index
    %c0_9 = arith.constant 0 : index
    %9 = vector.load %arg2[%c1_7, %c0_8, %c0_9] : memref<2x1x256xi32, #tpu.memory_space<vmem>>, vector<1x1x256xi32>
    %10 = vector.shape_cast %9 : vector<1x1x256xi32> to vector<1x256xi32>
    %c8_i32 = arith.constant 8 : i32
    %11 = vector.broadcast %c8_i32 : i32 to vector<1x256xi32>
    %12 = arith.addi %10, %11 : vector<1x256xi32>
    %13 = tpu.concatenate %8, %12 in 1 : vector<1x256xi32>, vector<1x256xi32> -> vector<1x512xi32>
    %c0_10 = arith.constant 0 : index
    %c0_11 = arith.constant 0 : index
    %14 = vector.load %arg3[%c0_10, %c0_11] : memref<4x256xf32, #tpu.memory_space<vmem>>, vector<4x256xf32>
    %15 = tpu.concatenate %14, %14 in 1 : vector<4x256xf32>, vector<4x256xf32> -> vector<4x512xf32>
    %cst = arith.constant 1.000000e+00 : f32
    %16 = vector.broadcast %cst : f32 to vector<1x512xf32>
    %17 = vector.extract_strided_slice %15 {offsets = [0, 0], sizes = [1, 512], strides = [1, 1]} : vector<4x512xf32> to vector<1x512xf32>
    %18 = vector.extract_strided_slice %15 {offsets = [1, 0], sizes = [1, 512], strides = [1, 1]} : vector<4x512xf32> to vector<1x512xf32>
    %19 = vector.extract_strided_slice %15 {offsets = [2, 0], sizes = [1, 512], strides = [1, 1]} : vector<4x512xf32> to vector<1x512xf32>
    %20 = vector.extract_strided_slice %15 {offsets = [3, 0], sizes = [1, 512], strides = [1, 1]} : vector<4x512xf32> to vector<1x512xf32>
    %21 = arith.mulf %17, %19 : vector<1x512xf32>
    %c17_i32 = arith.constant 17 : i32
    %22 = tpu.dynamic_rotate %4 by %c17_i32 dim 1 : vector<3x512xf32>, i32 -> vector<3x512xf32>
    %23 = vector.broadcast %21 : vector<1x512xf32> to vector<3x512xf32>
    %24 = arith.mulf %22, %23 : vector<3x512xf32>
    %25 = arith.mulf %17, %16 : vector<1x512xf32>
    %c16_i32 = arith.constant 16 : i32
    %26 = tpu.dynamic_rotate %4 by %c16_i32 dim 1 : vector<3x512xf32>, i32 -> vector<3x512xf32>
    %27 = vector.broadcast %25 : vector<1x512xf32> to vector<3x512xf32>
    %28 = arith.mulf %26, %27 : vector<3x512xf32>
    %29 = arith.mulf %17, %20 : vector<1x512xf32>
    %c15_i32 = arith.constant 15 : i32
    %30 = tpu.dynamic_rotate %4 by %c15_i32 dim 1 : vector<3x512xf32>, i32 -> vector<3x512xf32>
    %31 = vector.broadcast %29 : vector<1x512xf32> to vector<3x512xf32>
    %32 = arith.mulf %30, %31 : vector<3x512xf32>
    %33 = arith.mulf %16, %19 : vector<1x512xf32>
    %c1_i32 = arith.constant 1 : i32
    %34 = tpu.dynamic_rotate %4 by %c1_i32 dim 1 : vector<3x512xf32>, i32 -> vector<3x512xf32>
    %35 = vector.broadcast %33 : vector<1x512xf32> to vector<3x512xf32>
    %36 = arith.mulf %34, %35 : vector<3x512xf32>
    %37 = arith.mulf %16, %16 : vector<1x512xf32>
    %38 = vector.broadcast %37 : vector<1x512xf32> to vector<3x512xf32>
    %39 = arith.mulf %4, %38 : vector<3x512xf32>
    %40 = arith.mulf %16, %20 : vector<1x512xf32>
    %c511_i32 = arith.constant 511 : i32
    %41 = tpu.dynamic_rotate %4 by %c511_i32 dim 1 : vector<3x512xf32>, i32 -> vector<3x512xf32>
    %42 = vector.broadcast %40 : vector<1x512xf32> to vector<3x512xf32>
    %43 = arith.mulf %41, %42 : vector<3x512xf32>
    %44 = arith.mulf %18, %19 : vector<1x512xf32>
    %c497_i32 = arith.constant 497 : i32
    %45 = tpu.dynamic_rotate %4 by %c497_i32 dim 1 : vector<3x512xf32>, i32 -> vector<3x512xf32>
    %46 = vector.broadcast %44 : vector<1x512xf32> to vector<3x512xf32>
    %47 = arith.mulf %45, %46 : vector<3x512xf32>
    %48 = arith.mulf %18, %16 : vector<1x512xf32>
    %c496_i32 = arith.constant 496 : i32
    %49 = tpu.dynamic_rotate %4 by %c496_i32 dim 1 : vector<3x512xf32>, i32 -> vector<3x512xf32>
    %50 = vector.broadcast %48 : vector<1x512xf32> to vector<3x512xf32>
    %51 = arith.mulf %49, %50 : vector<3x512xf32>
    %52 = arith.mulf %18, %20 : vector<1x512xf32>
    %c495_i32 = arith.constant 495 : i32
    %53 = tpu.dynamic_rotate %4 by %c495_i32 dim 1 : vector<3x512xf32>, i32 -> vector<3x512xf32>
    %54 = vector.broadcast %52 : vector<1x512xf32> to vector<3x512xf32>
    %55 = arith.mulf %53, %54 : vector<3x512xf32>
    %56 = tpu.concatenate %24, %28, %32, %36, %39, %43, %47, %51, %55 in 0 : vector<3x512xf32>, vector<3x512xf32>, vector<3x512xf32>, vector<3x512xf32>, vector<3x512xf32>, vector<3x512xf32>, vector<3x512xf32>, vector<3x512xf32>, vector<3x512xf32> -> vector<27x512xf32>
    %c0_12 = arith.constant 0 : index
    %c0_13 = arith.constant 0 : index
    %57 = vector.load %arg4[%c0_12, %c0_13] : memref<27x1xf32, #tpu.memory_space<vmem>>, vector<27x1xf32>
    %58 = vector.broadcast %57 : vector<27x1xf32> to vector<27x512xf32>
    %59 = arith.mulf %58, %56 : vector<27x512xf32>
    %cst_14 = arith.constant dense<0.000000e+00> : vector<512xf32>
    %60 = vector.multi_reduction <add>, %59, %cst_14 [0] : vector<27x512xf32> to vector<512xf32>
    %61 = vector.shape_cast %60 : vector<512xf32> to vector<1x512xf32>
    %c0_15 = arith.constant 0 : index
    %c0_16 = arith.constant 0 : index
    %62 = vector.load %arg5[%c0_15, %c0_16] : memref<1x1xf32, #tpu.memory_space<vmem>>, vector<1x1xf32>
    %63 = vector.extract %62[0, 0] : f32 from vector<1x1xf32>
    %64 = vector.broadcast %63 : f32 to vector<1x512xf32>
    %65 = arith.addf %61, %64 : vector<1x512xf32>
    %66 = arith.negf %65 : vector<1x512xf32>
    %67 = math.exp %66 : vector<1x512xf32>
    %cst_17 = arith.constant 1.000000e+00 : f32
    %68 = vector.broadcast %cst_17 : f32 to vector<1x512xf32>
    %69 = arith.addf %68, %67 : vector<1x512xf32>
    %70 = arith.divf %68, %69 : vector<1x512xf32>
    %71 = tpu.iota {dimensions = array<i32: 0>} : vector<16x512xi32>
    %72 = vector.broadcast %13 : vector<1x512xi32> to vector<16x512xi32>
    %73 = arith.cmpi eq, %71, %72 : vector<16x512xi32>
    %74 = arith.extui %73 : vector<16x512xi1> to vector<16x512xi32>
    %75 = arith.sitofp %74 : vector<16x512xi32> to vector<16x512xf32>
    %cst_18 = arith.constant dense<0.000000e+00> : vector<16xf32>
    %76 = vector.multi_reduction <add>, %75, %cst_18 [1] : vector<16x512xf32> to vector<16xf32>
    %77 = vector.shape_cast %76 : vector<16xf32> to vector<16x1xf32>
    %78 = vector.broadcast %65 : vector<1x512xf32> to vector<16x512xf32>
    %79 = arith.mulf %75, %78 : vector<16x512xf32>
    %cst_19 = arith.constant dense<0.000000e+00> : vector<16xf32>
    %80 = vector.multi_reduction <add>, %79, %cst_19 [1] : vector<16x512xf32> to vector<16xf32>
    %81 = vector.shape_cast %80 : vector<16xf32> to vector<16x1xf32>
    %cst_20 = arith.constant 0.000000e+00 : f32
    %82 = vector.broadcast %cst_20 : f32 to vector<16x1xf32>
    %83 = arith.cmpf ogt, %77, %82 : vector<16x1xf32>
    %cst_21 = arith.constant 1.000000e+00 : f32
    %84 = vector.broadcast %cst_21 : f32 to vector<16x1xf32>
    %85 = arith.maximumf %77, %84 : vector<16x1xf32>
    %86 = arith.divf %81, %85 : vector<16x1xf32>
    %cst_22 = arith.constant 0.000000e+00 : f32
    %87 = vector.broadcast %cst_22 : f32 to vector<16x1xf32>
    %88 = arith.select %83, %86, %87 : vector<16x1xi1>, vector<16x1xf32>
    %89 = arith.negf %88 : vector<16x1xf32>
    %90 = math.exp %89 : vector<16x1xf32>
    %cst_23 = arith.constant 1.000000e+00 : f32
    %91 = vector.broadcast %cst_23 : f32 to vector<16x1xf32>
    %92 = arith.addf %91, %90 : vector<16x1xf32>
    %93 = arith.divf %91, %92 : vector<16x1xf32>
    %c0_24 = arith.constant 0 : index
    %c0_25 = arith.constant 0 : index
    %94 = vector.load %arg12[%c0_24, %c0_25] : memref<16x1xf32, #tpu.memory_space<vmem>>, vector<16x1xf32>
    tpu.vector_store %arg12[%c0_24, %c0_25], %93 {strides = array<i32>} : memref<16x1xf32, #tpu.memory_space<vmem>>, vector<16x1xf32>,
    %cst_26 = arith.constant 5.000000e-01 : f32
    %95 = vector.broadcast %cst_26 : f32 to vector<16x1xf32>
    %96 = arith.cmpf ogt, %93, %95 : vector<16x1xf32>
    %97 = arith.extui %96 : vector<16x1xi1> to vector<16x1xi32>
    %98 = arith.sitofp %97 : vector<16x1xi32> to vector<16x1xf32>
    %99 = vector.broadcast %98 : vector<16x1xf32> to vector<16x512xf32>
    %100 = arith.mulf %75, %99 : vector<16x512xf32>
    %cst_27 = arith.constant dense<0.000000e+00> : vector<512xf32>
    %101 = vector.multi_reduction <add>, %100, %cst_27 [0] : vector<16x512xf32> to vector<512xf32>
    %102 = vector.shape_cast %101 : vector<512xf32> to vector<1x512xf32>
    %103 = vector.broadcast %102 : vector<1x512xf32> to vector<3x512xf32>
    %104 = arith.mulf %4, %103 : vector<3x512xf32>
    %c0_28 = arith.constant 0 : index
    %c0_29 = arith.constant 0 : index
    %105 = vector.load %arg6[%c0_28, %c0_29] : memref<3x1xf32, #tpu.memory_space<vmem>>, vector<3x1xf32>
    %cst_30 = arith.constant 1.000000e+00 : f32
    %106 = vector.broadcast %cst_30 : f32 to vector<1x512xf32>
    %107 = arith.subf %106, %102 : vector<1x512xf32>
    %108 = vector.broadcast %105 : vector<3x1xf32> to vector<3x512xf32>
    %109 = vector.broadcast %107 : vector<1x512xf32> to vector<3x512xf32>
    %110 = arith.mulf %108, %109 : vector<3x512xf32>
    %111 = arith.addf %104, %110 : vector<3x512xf32>
    %c17_i32_31 = arith.constant 17 : i32
    %112 = tpu.dynamic_rotate %102 by %c17_i32_31 dim 1 : vector<1x512xf32>, i32 -> vector<1x512xf32>
    %113 = vector.broadcast %112 : vector<1x512xf32> to vector<3x512xf32>
    %114 = arith.mulf %24, %113 : vector<3x512xf32>
    %cst_32 = arith.constant 1.000000e+00 : f32
    %115 = vector.broadcast %cst_32 : f32 to vector<1x512xf32>
    %116 = arith.subf %115, %112 : vector<1x512xf32>
    %117 = arith.mulf %21, %116 : vector<1x512xf32>
    %c16_i32_33 = arith.constant 16 : i32
    %118 = tpu.dynamic_rotate %102 by %c16_i32_33 dim 1 : vector<1x512xf32>, i32 -> vector<1x512xf32>
    %119 = vector.broadcast %118 : vector<1x512xf32> to vector<3x512xf32>
    %120 = arith.mulf %28, %119 : vector<3x512xf32>
    %cst_34 = arith.constant 1.000000e+00 : f32
    %121 = vector.broadcast %cst_34 : f32 to vector<1x512xf32>
    %122 = arith.subf %121, %118 : vector<1x512xf32>
    %123 = arith.mulf %25, %122 : vector<1x512xf32>
    %c15_i32_35 = arith.constant 15 : i32
    %124 = tpu.dynamic_rotate %102 by %c15_i32_35 dim 1 : vector<1x512xf32>, i32 -> vector<1x512xf32>
    %125 = vector.broadcast %124 : vector<1x512xf32> to vector<3x512xf32>
    %126 = arith.mulf %32, %125 : vector<3x512xf32>
    %cst_36 = arith.constant 1.000000e+00 : f32
    %127 = vector.broadcast %cst_36 : f32 to vector<1x512xf32>
    %128 = arith.subf %127, %124 : vector<1x512xf32>
    %129 = arith.mulf %29, %128 : vector<1x512xf32>
    %c1_i32_37 = arith.constant 1 : i32
    %130 = tpu.dynamic_rotate %102 by %c1_i32_37 dim 1 : vector<1x512xf32>, i32 -> vector<1x512xf32>
    %131 = vector.broadcast %130 : vector<1x512xf32> to vector<3x512xf32>
    %132 = arith.mulf %36, %131 : vector<3x512xf32>
    %cst_38 = arith.constant 1.000000e+00 : f32
    %133 = vector.broadcast %cst_38 : f32 to vector<1x512xf32>
    %134 = arith.subf %133, %130 : vector<1x512xf32>
    %135 = arith.mulf %33, %134 : vector<1x512xf32>
    %136 = vector.broadcast %102 : vector<1x512xf32> to vector<3x512xf32>
    %137 = arith.mulf %39, %136 : vector<3x512xf32>
    %cst_39 = arith.constant 1.000000e+00 : f32
    %138 = vector.broadcast %cst_39 : f32 to vector<1x512xf32>
    %139 = arith.subf %138, %102 : vector<1x512xf32>
    %140 = arith.mulf %37, %139 : vector<1x512xf32>
    %c511_i32_40 = arith.constant 511 : i32
    %141 = tpu.dynamic_rotate %102 by %c511_i32_40 dim 1 : vector<1x512xf32>, i32 -> vector<1x512xf32>
    %142 = vector.broadcast %141 : vector<1x512xf32> to vector<3x512xf32>
    %143 = arith.mulf %43, %142 : vector<3x512xf32>
    %cst_41 = arith.constant 1.000000e+00 : f32
    %144 = vector.broadcast %cst_41 : f32 to vector<1x512xf32>
    %145 = arith.subf %144, %141 : vector<1x512xf32>
    %146 = arith.mulf %40, %145 : vector<1x512xf32>
    %c497_i32_42 = arith.constant 497 : i32
    %147 = tpu.dynamic_rotate %102 by %c497_i32_42 dim 1 : vector<1x512xf32>, i32 -> vector<1x512xf32>
    %148 = vector.broadcast %147 : vector<1x512xf32> to vector<3x512xf32>
    %149 = arith.mulf %47, %148 : vector<3x512xf32>
    %cst_43 = arith.constant 1.000000e+00 : f32
    %150 = vector.broadcast %cst_43 : f32 to vector<1x512xf32>
    %151 = arith.subf %150, %147 : vector<1x512xf32>
    %152 = arith.mulf %44, %151 : vector<1x512xf32>
    %c496_i32_44 = arith.constant 496 : i32
    %153 = tpu.dynamic_rotate %102 by %c496_i32_44 dim 1 : vector<1x512xf32>, i32 -> vector<1x512xf32>
    %154 = vector.broadcast %153 : vector<1x512xf32> to vector<3x512xf32>
    %155 = arith.mulf %51, %154 : vector<3x512xf32>
    %cst_45 = arith.constant 1.000000e+00 : f32
    %156 = vector.broadcast %cst_45 : f32 to vector<1x512xf32>
    %157 = arith.subf %156, %153 : vector<1x512xf32>
    %158 = arith.mulf %48, %157 : vector<1x512xf32>
    %c495_i32_46 = arith.constant 495 : i32
    %159 = tpu.dynamic_rotate %102 by %c495_i32_46 dim 1 : vector<1x512xf32>, i32 -> vector<1x512xf32>
    %160 = vector.broadcast %159 : vector<1x512xf32> to vector<3x512xf32>
    %161 = arith.mulf %55, %160 : vector<3x512xf32>
    %cst_47 = arith.constant 1.000000e+00 : f32
    %162 = vector.broadcast %cst_47 : f32 to vector<1x512xf32>
    %163 = arith.subf %162, %159 : vector<1x512xf32>
    %164 = arith.mulf %52, %163 : vector<1x512xf32>
    %165 = tpu.concatenate %114, %120, %126, %132, %137, %143, %149, %155, %161, %117, %123, %129, %135, %140, %146, %152 in 0 : vector<3x512xf32>, vector<3x512xf32>, vector<3x512xf32>, vector<3x512xf32>, vector<3x512xf32>, vector<3x512xf32>, vector<3x512xf32>, vector<3x512xf32>, vector<3x512xf32>, vector<1x512xf32>, vector<1x512xf32>, vector<1x512xf32>, vector<1x512xf32>, vector<1x512xf32>, vector<1x512xf32>, vector<1x512xf32> -> vector<34x512xf32>
    %166 = tpu.concatenate %158, %164 in 0 : vector<1x512xf32>, vector<1x512xf32> -> vector<2x512xf32>
    %167 = tpu.concatenate %165, %166 in 0 : vector<34x512xf32>, vector<2x512xf32> -> vector<36x512xf32>
    %c0_48 = arith.constant 0 : index
    %c0_49 = arith.constant 0 : index
    %168 = vector.load %arg7[%c0_48, %c0_49] : memref<32x36xf32, #tpu.memory_space<vmem>>, vector<32x36xf32>
    %cst_50 = arith.constant dense<0.000000e+00> : vector<32x512xf32>
    %169 = tpu.matmul %168, %167, %cst_50 {dimension_numbers = #tpu.dot_dimension_numbers<[1], [0], [0], [1], [0, 0, 1, 1], [], []>} : vector<32x36xf32>, vector<36x512xf32>, vector<32x512xf32> -> vector<32x512xf32>
    %c0_51 = arith.constant 0 : index
    %c0_52 = arith.constant 0 : index
    %170 = vector.load %arg8[%c0_51, %c0_52] : memref<32x1xf32, #tpu.memory_space<vmem>>, vector<32x1xf32>
    %171 = vector.broadcast %170 : vector<32x1xf32> to vector<32x512xf32>
    %172 = arith.addf %169, %171 : vector<32x512xf32>
    %cst_53 = arith.constant 0.000000e+00 : f32
    %173 = vector.broadcast %cst_53 : f32 to vector<32x512xf32>
    %174 = arith.maximumf %172, %173 : vector<32x512xf32>
    %175 = vector.extract_strided_slice %174 {offsets = [0, 0], sizes = [32, 256], strides = [1, 1]} : vector<32x512xf32> to vector<32x256xf32>
    %cst_54 = arith.constant dense<0.000000e+00> : vector<32xf32>
    %176 = vector.multi_reduction <add>, %175, %cst_54 [1] : vector<32x256xf32> to vector<32xf32>
    %177 = vector.shape_cast %176 : vector<32xf32> to vector<32x1xf32>
    %cst_55 = arith.constant 2.560000e+02 : f32
    %178 = vector.broadcast %cst_55 : f32 to vector<32x1xf32>
    %179 = arith.divf %177, %178 : vector<32x1xf32>
    %c0_56 = arith.constant 0 : index
    %c0_57 = arith.constant 0 : index
    %180 = vector.load %arg9[%c0_56, %c0_57] : memref<32x10xf32, #tpu.memory_space<vmem>>, vector<32x10xf32>
    %181 = vector.broadcast %179 : vector<32x1xf32> to vector<32x10xf32>
    %182 = arith.mulf %180, %181 : vector<32x10xf32>
    %cst_58 = arith.constant dense<0.000000e+00> : vector<10xf32>
    %183 = vector.multi_reduction <add>, %182, %cst_58 [0] : vector<32x10xf32> to vector<10xf32>
    %184 = vector.shape_cast %183 : vector<10xf32> to vector<1x10xf32>
    %c0_59 = arith.constant 0 : index
    %c0_60 = arith.constant 0 : index
    %185 = vector.load %arg10[%c0_59, %c0_60] : memref<1x10xf32, #tpu.memory_space<vmem>>, vector<1x10xf32>
    %186 = arith.addf %184, %185 : vector<1x10xf32>
    %cst_61 = arith.constant dense<0xFF800000> : vector<1xf32>
    %187 = vector.multi_reduction <maximumf>, %186, %cst_61 [1] : vector<1x10xf32> to vector<1xf32>
    %188 = vector.shape_cast %187 : vector<1xf32> to vector<1x1xf32>
    %189 = vector.broadcast %188 : vector<1x1xf32> to vector<1x10xf32>
    %190 = arith.subf %186, %189 : vector<1x10xf32>
    %191 = math.exp %190 : vector<1x10xf32>
    %cst_62 = arith.constant dense<0.000000e+00> : vector<1xf32>
    %192 = vector.multi_reduction <add>, %191, %cst_62 [1] : vector<1x10xf32> to vector<1xf32>
    %193 = vector.shape_cast %192 : vector<1xf32> to vector<1x1xf32>
    %194 = vector.broadcast %193 : vector<1x1xf32> to vector<1x10xf32>
    %195 = arith.divf %191, %194 : vector<1x10xf32>
    %cst_63 = arith.constant 9.99999997E-7 : f32
    %196 = vector.broadcast %cst_63 : f32 to vector<1x10xf32>
    %197 = arith.addf %195, %196 : vector<1x10xf32>
    %198 = math.log %197 : vector<1x10xf32>
    %c0_64 = arith.constant 0 : index
    %c0_65 = arith.constant 0 : index
    %c0_66 = arith.constant 0 : index
    %199 = vector.load %arg14[%c0_64, %c0_65, %c0_66] : memref<2x1x10xf32, #tpu.memory_space<vmem>>, vector<1x1x10xf32>
    %200 = vector.shape_cast %199 : vector<1x1x10xf32> to vector<1x10xf32>
    %201 = vector.shape_cast %198 : vector<1x10xf32> to vector<1x1x10xf32>
    tpu.vector_store %arg14[%c0_64, %c0_65, %c0_66], %201 {strides = array<i32>} : memref<2x1x10xf32, #tpu.memory_space<vmem>>, vector<1x1x10xf32>,
    %202 = vector.extract_strided_slice %70 {offsets = [0, 0], sizes = [1, 256], strides = [1, 1]} : vector<1x512xf32> to vector<1x256xf32>
    %c0_67 = arith.constant 0 : index
    %c0_68 = arith.constant 0 : index
    %c0_69 = arith.constant 0 : index
    %203 = vector.load %arg11[%c0_67, %c0_68, %c0_69] : memref<2x1x256xf32, #tpu.memory_space<vmem>>, vector<1x1x256xf32>
    %204 = vector.shape_cast %203 : vector<1x1x256xf32> to vector<1x256xf32>
    %205 = vector.shape_cast %202 : vector<1x256xf32> to vector<1x1x256xf32>
    tpu.vector_store %arg11[%c0_67, %c0_68, %c0_69], %205 {strides = array<i32>} : memref<2x1x256xf32, #tpu.memory_space<vmem>>, vector<1x1x256xf32>,
    %206 = vector.extract_strided_slice %111 {offsets = [0, 0], sizes = [3, 256], strides = [1, 1]} : vector<3x512xf32> to vector<3x256xf32>
    %c0_70 = arith.constant 0 : index
    %c0_71 = arith.constant 0 : index
    %c0_72 = arith.constant 0 : index
    %207 = vector.load %arg13[%c0_70, %c0_71, %c0_72] : memref<2x3x256xf32, #tpu.memory_space<vmem>>, vector<1x3x256xf32>
    %208 = vector.shape_cast %207 : vector<1x3x256xf32> to vector<3x256xf32>
    %209 = vector.shape_cast %206 : vector<3x256xf32> to vector<1x3x256xf32>
    tpu.vector_store %arg13[%c0_70, %c0_71, %c0_72], %209 {strides = array<i32>} : memref<2x3x256xf32, #tpu.memory_space<vmem>>, vector<1x3x256xf32>,
    %210 = vector.extract_strided_slice %174 {offsets = [0, 256], sizes = [32, 256], strides = [1, 1]} : vector<32x512xf32> to vector<32x256xf32>
    %cst_73 = arith.constant dense<0.000000e+00> : vector<32xf32>
    %211 = vector.multi_reduction <add>, %210, %cst_73 [1] : vector<32x256xf32> to vector<32xf32>
    %212 = vector.shape_cast %211 : vector<32xf32> to vector<32x1xf32>
    %cst_74 = arith.constant 2.560000e+02 : f32
    %213 = vector.broadcast %cst_74 : f32 to vector<32x1xf32>
    %214 = arith.divf %212, %213 : vector<32x1xf32>
    %c0_75 = arith.constant 0 : index
    %c0_76 = arith.constant 0 : index
    %215 = vector.load %arg9[%c0_75, %c0_76] : memref<32x10xf32, #tpu.memory_space<vmem>>, vector<32x10xf32>
    %216 = vector.broadcast %214 : vector<32x1xf32> to vector<32x10xf32>
    %217 = arith.mulf %215, %216 : vector<32x10xf32>
    %cst_77 = arith.constant dense<0.000000e+00> : vector<10xf32>
    %218 = vector.multi_reduction <add>, %217, %cst_77 [0] : vector<32x10xf32> to vector<10xf32>
    %219 = vector.shape_cast %218 : vector<10xf32> to vector<1x10xf32>
    %c0_78 = arith.constant 0 : index
    %c0_79 = arith.constant 0 : index
    %220 = vector.load %arg10[%c0_78, %c0_79] : memref<1x10xf32, #tpu.memory_space<vmem>>, vector<1x10xf32>
    %221 = arith.addf %219, %220 : vector<1x10xf32>
    %cst_80 = arith.constant dense<0xFF800000> : vector<1xf32>
    %222 = vector.multi_reduction <maximumf>, %221, %cst_80 [1] : vector<1x10xf32> to vector<1xf32>
    %223 = vector.shape_cast %222 : vector<1xf32> to vector<1x1xf32>
    %224 = vector.broadcast %223 : vector<1x1xf32> to vector<1x10xf32>
    %225 = arith.subf %221, %224 : vector<1x10xf32>
    %226 = math.exp %225 : vector<1x10xf32>
    %cst_81 = arith.constant dense<0.000000e+00> : vector<1xf32>
    %227 = vector.multi_reduction <add>, %226, %cst_81 [1] : vector<1x10xf32> to vector<1xf32>
    %228 = vector.shape_cast %227 : vector<1xf32> to vector<1x1xf32>
    %229 = vector.broadcast %228 : vector<1x1xf32> to vector<1x10xf32>
    %230 = arith.divf %226, %229 : vector<1x10xf32>
    %cst_82 = arith.constant 9.99999997E-7 : f32
    %231 = vector.broadcast %cst_82 : f32 to vector<1x10xf32>
    %232 = arith.addf %230, %231 : vector<1x10xf32>
    %233 = math.log %232 : vector<1x10xf32>
    %c1_83 = arith.constant 1 : index
    %c0_84 = arith.constant 0 : index
    %c0_85 = arith.constant 0 : index
    %234 = vector.load %arg14[%c1_83, %c0_84, %c0_85] : memref<2x1x10xf32, #tpu.memory_space<vmem>>, vector<1x1x10xf32>
    %235 = vector.shape_cast %234 : vector<1x1x10xf32> to vector<1x10xf32>
    %236 = vector.shape_cast %233 : vector<1x10xf32> to vector<1x1x10xf32>
    tpu.vector_store %arg14[%c1_83, %c0_84, %c0_85], %236 {strides = array<i32>} : memref<2x1x10xf32, #tpu.memory_space<vmem>>, vector<1x1x10xf32>,
    %237 = vector.extract_strided_slice %70 {offsets = [0, 256], sizes = [1, 256], strides = [1, 1]} : vector<1x512xf32> to vector<1x256xf32>
    %c1_86 = arith.constant 1 : index
    %c0_87 = arith.constant 0 : index
    %c0_88 = arith.constant 0 : index
    %238 = vector.load %arg11[%c1_86, %c0_87, %c0_88] : memref<2x1x256xf32, #tpu.memory_space<vmem>>, vector<1x1x256xf32>
    %239 = vector.shape_cast %238 : vector<1x1x256xf32> to vector<1x256xf32>
    %240 = vector.shape_cast %237 : vector<1x256xf32> to vector<1x1x256xf32>
    tpu.vector_store %arg11[%c1_86, %c0_87, %c0_88], %240 {strides = array<i32>} : memref<2x1x256xf32, #tpu.memory_space<vmem>>, vector<1x1x256xf32>,
    %241 = vector.extract_strided_slice %111 {offsets = [0, 256], sizes = [3, 256], strides = [1, 1]} : vector<3x512xf32> to vector<3x256xf32>
    %c1_89 = arith.constant 1 : index
    %c0_90 = arith.constant 0 : index
    %c0_91 = arith.constant 0 : index
    %242 = vector.load %arg13[%c1_89, %c0_90, %c0_91] : memref<2x3x256xf32, #tpu.memory_space<vmem>>, vector<1x3x256xf32>
    %243 = vector.shape_cast %242 : vector<1x3x256xf32> to vector<3x256xf32>
    %244 = vector.shape_cast %241 : vector<3x256xf32> to vector<1x3x256xf32>
    tpu.vector_store %arg13[%c1_89, %c0_90, %c0_91], %244 {strides = array<i32>} : memref<2x3x256xf32, #tpu.memory_space<vmem>>, vector<1x3x256xf32>,
    return
  }
  func.func @transform_0(%arg0: i32) -> (i32, i32, i32) {
    %c0_i32 = arith.constant 0 : i32
    %c0_i32_0 = arith.constant 0 : i32
    %c0_i32_1 = arith.constant 0 : i32
    return %arg0, %c0_i32, %c0_i32_0 : i32, i32, i32
  }
  func.func @transform_1(%arg0: i32) -> (i32, i32, i32) {
    %c0_i32 = arith.constant 0 : i32
    %c0_i32_0 = arith.constant 0 : i32
    %c0_i32_1 = arith.constant 0 : i32
    return %arg0, %c0_i32, %c0_i32_0 : i32, i32, i32
  }
  func.func @transform_2(%arg0: i32) -> (i32, i32) {
    %c0_i32 = arith.constant 0 : i32
    %c0_i32_0 = arith.constant 0 : i32
    %c0_i32_1 = arith.constant 0 : i32
    return %c0_i32, %c0_i32_0 : i32, i32
  }
  func.func @transform_3(%arg0: i32) -> (i32, i32) {
    %c0_i32 = arith.constant 0 : i32
    %c0_i32_0 = arith.constant 0 : i32
    %c0_i32_1 = arith.constant 0 : i32
    return %c0_i32, %c0_i32_0 : i32, i32
  }
  func.func @transform_4(%arg0: i32) -> (i32, i32) {
    %c0_i32 = arith.constant 0 : i32
    %c0_i32_0 = arith.constant 0 : i32
    %c0_i32_1 = arith.constant 0 : i32
    return %c0_i32, %c0_i32_0 : i32, i32
  }
  func.func @transform_5(%arg0: i32) -> (i32, i32) {
    %c0_i32 = arith.constant 0 : i32
    %c0_i32_0 = arith.constant 0 : i32
    %c0_i32_1 = arith.constant 0 : i32
    return %c0_i32, %c0_i32_0 : i32, i32
  }
  func.func @transform_6(%arg0: i32) -> (i32, i32) {
    %c0_i32 = arith.constant 0 : i32
    %c0_i32_0 = arith.constant 0 : i32
    %c0_i32_1 = arith.constant 0 : i32
    return %c0_i32, %c0_i32_0 : i32, i32
  }
  func.func @transform_7(%arg0: i32) -> (i32, i32) {
    %c0_i32 = arith.constant 0 : i32
    %c0_i32_0 = arith.constant 0 : i32
    %c0_i32_1 = arith.constant 0 : i32
    return %c0_i32, %c0_i32_0 : i32, i32
  }
  func.func @transform_8(%arg0: i32) -> (i32, i32) {
    %c0_i32 = arith.constant 0 : i32
    %c0_i32_0 = arith.constant 0 : i32
    %c0_i32_1 = arith.constant 0 : i32
    return %c0_i32, %c0_i32_0 : i32, i32
  }
  func.func @transform_9(%arg0: i32) -> (i32, i32) {
    %c0_i32 = arith.constant 0 : i32
    %c0_i32_0 = arith.constant 0 : i32
    %c0_i32_1 = arith.constant 0 : i32
    return %c0_i32, %c0_i32_0 : i32, i32
  }
  func.func @transform_10(%arg0: i32) -> (i32, i32, i32) {
    %c0_i32 = arith.constant 0 : i32
    %c0_i32_0 = arith.constant 0 : i32
    %c0_i32_1 = arith.constant 0 : i32
    return %arg0, %c0_i32, %c0_i32_0 : i32, i32, i32
  }
  func.func @transform_11(%arg0: i32) -> (i32, i32) {
    %c0_i32 = arith.constant 0 : i32
    %c0_i32_0 = arith.constant 0 : i32
    return %arg0, %c0_i32 : i32, i32
  }
  func.func @transform_12(%arg0: i32) -> (i32, i32, i32) {
    %c0_i32 = arith.constant 0 : i32
    %c0_i32_0 = arith.constant 0 : i32
    %c0_i32_1 = arith.constant 0 : i32
    return %arg0, %c0_i32, %c0_i32_0 : i32, i32, i32
  }
  func.func @transform_13(%arg0: i32) -> (i32, i32, i32) {
    %c0_i32 = arith.constant 0 : i32
    %c0_i32_0 = arith.constant 0 : i32
    %c0_i32_1 = arith.constant 0 : i32
    return %arg0, %c0_i32, %c0_i32_0 : i32, i32, i32
  }
}

</mosaic_0001>

<bundles_post_ra>
// kernel: p2p_forward.1
= control target key start
LH: loop header
LB: loop body
LE: loop exit
PB: predicated region body
PF: predicated region fallthrough
CT: control target
= control target key end

     0   :  { %s4043_s0 = inlined_call_operand.vmem [shape: f32[4,3,256], index: 0, kind: input, shape index: {}]   ;;  %s4044_s1 = inlined_call_operand.vmem [shape: s32[4,1,256], index: 1, kind: input, shape index: {}]   ;;  %s4045_s2 = inlined_call_operand.vmem [shape: f32[4,256], index: 2, kind: input, shape index: {}]   ;;  %s4046_s3 = inlined_call_operand.vmem [shape: f32[27,1], index: 3, kind: input, shape index: {}]   ;;  %s4047_s4 = inlined_call_operand.<no memory space> [shape: f32[1,1], index: 4, kind: input, shape index: {}]   ;;  %s4048_s5 = inlined_call_operand.vmem [shape: f32[3,1], index: 5, kind: input, shape index: {}]   ;;  %s4049_s6 = inlined_call_operand.vmem [shape: f32[32,36], index: 6, kind: input, shape index: {}]   ;;  %s4050_s7 = inlined_call_operand.vmem [shape: f32[32,1], index: 7, kind: input, shape index: {}]   ;;  %s4051_s8 = inlined_call_operand.vmem [shape: f32[32,10], index: 8, kind: input, shape index: {}]   ;;  %s4052_s9 = inlined_call_operand.vmem [shape: f32[1,10], index: 9, kind: input, shape index: {}]   ;;  %s4053_s10 = inlined_call_operand.vmem [shape: f32[4,1,256], index: 10, kind: output, shape index: {0}]   ;;  %s4054_s11 = inlined_call_operand.vmem [shape: f32[32,1], index: 11, kind: output, shape index: {1}]   ;;  %s4055_s12 = inlined_call_operand.vmem [shape: f32[4,3,256], index: 12, kind: output, shape index: {2}]   ;;  %s4056_s13 = inlined_call_operand.hbm [shape: f32[4,1,10], index: 13, kind: output, shape index: {3}]  }
   0x1   :  { %4125 = sst [smem:[#allocation32_spill]] %s4043_s0  ;;  %v19_v0 = vstv %s4047_s4 }
   0x2   :  { %4126 = sst [smem:[#allocation33_spill]] %s4044_s1  ;;  %20 = vst [vmem:[#allocation2] sm:$0x1] %v19_v0 }
   0x3   :  { %4127 = sst [smem:[#allocation34_spill]] %s4046_s3 }
   0x4   :  { %21 = vsyncpa [#allocation4], 0 }
   0x5   :  { %23 = vsyncpa [#allocation4 + $0x1], 0  ;;  %s2686_s27 = smov 0   ;;  %s2688_s28 = smov 0  }
   0x6   :  { %s2690_s29 = smov 0   ;;  %s2692_s30 = smov 0  }
   0x7 LB: > { %s2707_s4 = sadd.s32 4294967295, %s2599_s30   ;;  %s2363_s14 = sadd.s32 4294967294, %s2599_s30   ;;  %s2599_s30 = sphi %s2692_s30, %s4283_s30   ;;  %s2595_s29 = sphi %s2690_s29, %s4282_s29   ;;  %s2591_s28 = sphi %s2688_s28, %s4281_s28   ;;  %s2587_s27 = sphi %s2686_s27, %s4280_s27  }
   0x8   : > { %s2711_s15 = sadd.s32 1, %s2599_s30   ;;  %s334_s16 = sadd.s32 1, %s2595_s29 }
   0x9   : > { %s331_s17 = ssub.s32 %s2599_s30, %s2711_s15  ;;  %p344_p0 = scmp.ne.s32.totalorder %s2595_s29, %s2591_s28 }
   0xa   : > { %p332_p1 = scmp.eq.s32.totalorder %s331_s17, 0  ;;  %p345_p2 = scmp.eq.s32.totalorder %s2707_s4, 1 }
   0xb   : > { %p350_p3 = scmp.ne.s32.totalorder %s2591_s28, %s2587_s27  ;;  %p351_p4 = scmp.eq.s32.totalorder %s2363_s14, 1 }
   0xc   : > { %s2722_s18 = scalar_select %p332_p1, %s2595_s29, %s334_s16  }
   0xd   : > { %p2724_p5 = por %p345_p2, %p344_p0  ;;  %p2728_p6 = por %p351_p4, %p350_p3 }
   0xe   : > { %4128 = sst [smem:[#allocation6_spill]] %s2722_s18  ;;  %p2366_p7 = scmp.ge.s32.totalorder %s2599_s30, 1 }
   0xf   : > { %p412_p8 = scmp.lt.s32.totalorder %s2599_s30, 3 }
  0x11   : > { %p413_p9 = pnand %p2366_p7, %p412_p8 }
  0x13   : > { %416 = sbr.rel (%p413_p9) target bundleno = 1396 (0x574), region = 60 }
  0x1a   : > { %s2368_s21 = sshll.u32 %s2707_s4, 1  ;;  %v2601_v1 = vmov 0   ;;  %s4131_s0 = sld [smem:[#allocation32_spill]]  ;;  %v959_v8 = vld [vmem:[#allocation2] sm:$0x1]  ;;  %v4073_v11 = vlaneseq  ;;  %v4071_v26 = vmov 0.0  }
  0x1b   : > { %p479_p10 = scmp.lt.s32.totalorder %s2368_s21, 3  ;;  %2489 = vset.pattern.permute.xlu1 %v2601_v1  ;;  %2490 = vset.pattern.permute.xlu0 %v2601_v1  ;;  %s4059_s26 = smov 1   ;;  %2437 = vpush %v959_v8  ;;  %v2909_v52 = vld [vmem:[%s4045_s2] sm:$0xff]  ;;  %vm854_vm11 = vcmask 1040384   ;;  %vm859_vm14 = vcmask 1043456   ;;  %vm844_vm15 = vcmask 1042432  }
  0x1c   : > { %s4057_s14 = smov 15   ;;  %s4063_s16 = smov 16   ;;  %v2837_v12 = vshrl.u32 %v4073_v11, 7  ;;  %1875 = vmatprep.mubr.f32.mxu0 %v4071_v26  ;;  %1964 = vmatprep.mubr.f32.mxu1 %v4071_v26  ;;  %4138 = vst [vmem:[#allocation8_spill] sm:$0xff] %v2909_v52  ;;  %v2915_v55 = vcombine.high %v2909_v52, %v2909_v52  ;;  %v602_v56 = vrot.slane %v2909_v52, 3  ;;  %v2922_v60 = vand.u32 127, %v4073_v11 }
  0x1d   : > { %s4285_s21 = smov (!%p479_p10, %s2368_s21), 3  ;;  %s4132_s3 = sld [smem:[#allocation34_spill]] }
  0x1e   : > { %s2738_s22 = sshll.u32 %s4285_s21, 3  ;;  %s4065_s18 = smov 127   ;;  %v2841_v13 = vsub.s32 0, %v2837_v12  ;;  %v2844_v14 = vsub.s32 1, %v2837_v12  ;;  %v992_v23 = vadd.s32 8, %v2837_v12  ;;  %4139 = vst [vmem:[#allocation9_spill] sm:$0xff] %v2915_v55  ;;  %v2925_v61 = vmul.f32 %v602_v56, %v2909_v52 }
  0x1f   : > { %s4061_s17 = smov 17   ;;  %s2372_s23 = sshll.u32 %s4285_s21, 1  ;;  %v603_v59 = vrot.slane %v2915_v55, 3  ;;  %v648_v62 = vsub.s32 2, %v2837_v12  ;;  %v545_v1 = vrot.slane %v2915_v55, 2  ;;  %vm616_vm8 = vcmp.lt.s32.totalorder %v2922_v60, 15 }
  0x20   : > { %s2744_s25 = scalar_lea.vmem %s4131_s0, %s2738_s22  ;;  %s4134_s0 = smov 1   ;;  %4136 = vst [vmem:[#allocation7_spill] sm:$0xff] %v2841_v13  ;;  %4140 = vst [vmem:[#allocation10_spill] sm:$0xff] %v2925_v61  ;;  %v624_v8 = vrot.slane %v2925_v61, %v2841_v13  ;;  %vm641_vm9 = vcmp.lt.s32.totalorder %v2922_v60, 1  ;;  %vm585_vm10 = vcmp.lt.s32.totalorder %v2922_v60, 16  ;;  %vm666_vm12 = vcmp.lt.s32.totalorder %v2922_v60, 127 }
  0x21   : > { %v2747_v2 = vld [vmem:[%s2744_s25] sm:$0x77]  ;;  %v2750_v3 = vld [vmem:[%s2744_s25 + $0x8] sm:$0x77]  ;;  %s4137_s1 = sld [smem:[#allocation33_spill]]  ;;  %vm560_vm13 = vcmp.lt.s32.totalorder %v2922_v60, 17 }
  0x22   : > { %633 = vrot.lane.b32.xlu1 %v2747_v2, %s4059_s26  ;;  %608 = vrot.lane.b32.xlu0 %v2747_v2, %s4057_s14  ;;  %v2758_v4 = vcombine.high %v2750_v3, %v2750_v3  ;;  %v2762_v5 = vcombine.high %v2747_v2, %v2747_v2  ;;  %s2612_s21 = smov [#allocation3]  }
  0x23   : > { %v879_v6 = vld [vmem:[%s4132_s3] sm:$0xff]  ;;  %v880_v7 = vld [vmem:[%s4132_s3 + $0x8] sm:$0xff]  ;;  %v881_v9 = vld [vmem:[%s4132_s3 + $0x10] sm:$0xff] }
  0x24   : > { %v882_v10 = vld [vmem:[%s4132_s3 + $0x18] sm:$0x7] }
  0x26   : > { %614 = vrot.lane.b32.xlu1 %v2758_v4, %s4057_s14  ;;  %610 = vrot.lane.b32.xlu0 %v2762_v5, %s4057_s14  ;;  %s4069_s14 = smov 113  }
  0x2a   : > { %639 = vrot.lane.b32.xlu1 %v2758_v4, %s4059_s26  ;;  %635 = vrot.lane.b32.xlu0 %v2762_v5, %s4059_s26  ;;  %s4133_s26 = smov 15  }
  0x2e   : > { %579 = vrot.lane.b32.xlu1 %v2762_v5, %s4063_s16  ;;  %577 = vrot.lane.b32.xlu0 %v2747_v2, %s4063_s16 }
  0x32   : > { %885 = vperm.xlu1 %2489, %v879_v6   ;;  %583 = vrot.lane.b32.xlu0 %v2758_v4, %s4063_s16  ;;  %v2934_v6 = vmul.f32 %v603_v59, %v2915_v55 }
  0x34   : > { %4141 = vst [vmem:[#allocation11_spill] sm:$0xff] %v2934_v6 }
  0x36   : > { %612 = vrot.lane.b32.xlu1 %v2750_v3, %s4133_s26  ;;  %890 = vperm.xlu0 %2490, %v880_v7   ;;  %v673_v7 = vsub.s32 3, %v2837_v12 }
  0x3a   : > { %637 = vrot.lane.b32.xlu1 %v2750_v3, %s4134_s0  ;;  %658 = vrot.lane.b32.xlu0 %v2747_v2, %s4065_s18 }
  0x3e   : > { %660 = vrot.lane.b32.xlu1 %v2762_v5, %s4065_s18  ;;  %662 = vrot.lane.b32.xlu0 %v2750_v3, %s4065_s18 }
  0x42   : > { %550 = vrot.lane.b32.xlu1 %v2747_v2, %s4061_s17  ;;  %552 = vrot.lane.b32.xlu0 %v2762_v5, %s4061_s17 }
  0x46   : > { %556 = vrot.lane.b32.xlu1 %v2758_v4, %s4061_s17  ;;  %581 = vrot.lane.b32.xlu0 %v2750_v3, %s4063_s16  ;;  %s4067_s17 = smov 112   ;;  %s4135_s16 = smov 17  }
  0x4a   : > { %689 = vrot.lane.b32.xlu1 %v2747_v2, %s4069_s14  ;;  %691 = vrot.lane.b32.xlu0 %v2762_v5, %s4069_s14 }
  0x4c   : > { %s2438_s24 = spop %2437 }
  0x4e   : > { %693 = vrot.lane.b32.xlu1 %v2750_v3, %s4069_s14  ;;  %895 = vperm.xlu0 %2490, %v881_v9   ;;  %v544_v9 = vrot.slane %v2909_v52, 2 }
  0x52   : > { %664 = vrot.lane.b32.xlu1 %v2758_v4, %s4065_s18  ;;  %714 = vrot.lane.b32.xlu0 %v2747_v2, %s4067_s17  ;;  %s2609_s18 = smov 111  }
  0x56   : > { %716 = vrot.lane.b32.xlu1 %v2762_v5, %s4067_s17  ;;  %718 = vrot.lane.b32.xlu0 %v2750_v3, %s4067_s17 }
  0x5a   : > { %900 = vperm.xlu1 %2489, %v882_v10   ;;  %554 = vrot.lane.b32.xlu0 %v2750_v3, %s4135_s16  ;;  %v649_v10 = vrot.slane %v2909_v52, %v648_v62 }
  0x5e   : > { %695 = vrot.lane.b32.xlu1 %v2758_v4, %s4069_s14  ;;  %720 = vrot.lane.b32.xlu0 %v2758_v4, %s4067_s17  ;;  %s489_s14 = scalar_lea.vmem %s4137_s1, %s2372_s23  ;;  %s501_s17 = scalar_lea.vmem %s4054_s11, %s2738_s22 }
  0x5f   : > { %v520_v15 = vld [vmem:[%s489_s14] sm:$0x3]  ;;  %v2381_v16 = vld [vmem:[%s489_s14 + $0x2] sm:$0x3]  ;;  %s4169_s14 = smov 16  }
  0x60   : > { %v523_v17 = vadd.s32 8, %v2381_v16  ;;  %v527_v18 = vrot.slane %v520_v15, %v2841_v13  ;;  %v531_v19 = vrot.slane %v520_v15, %v2844_v14  ;;  %v2946_v15 = vrot.slane %v2915_v55, %v2841_v13 }
  0x62   : > { %739 = vrot.lane.b32.xlu1 %v2747_v2, %s2609_s18  ;;  %741 = vrot.lane.b32.xlu0 %v2762_v5, %s2609_s18  ;;  %v535_v20 = vrot.slane %v523_v17, %v2841_v13  ;;  %v996_v21 = vrot.slane %v527_v18, %v2841_v13  ;;  %v1000_v22 = vrot.slane %v531_v19, %v2841_v13  ;;  %v683_v19 = vrot.slane %v2909_v52, 1 }
  0x63   : > { %v539_v24 = vrot.slane %v523_v17, %v2844_v14  ;;  %v2951_v17 = vmul.f32 %v545_v1, %v2915_v55 }
  0x64   : > { %v1004_v25 = vrot.slane %v535_v20, %v2841_v13  ;;  %vm1013_vm0 = vcmp.eq.s32.totalorder %v992_v23, %v996_v21  ;;  %vm1014_vm1 = vcmp.eq.s32.totalorder %v992_v23, %v1000_v22  ;;  %vm1009_vm3 = vcmp.eq.s32.totalorder %v2837_v12, %v996_v21 }
  0x65   : > { %v2862_v27 = vsel %vm1013_vm0, 1.0, %v4071_v26  ;;  %v2865_v28 = vsel %vm1014_vm1, 1.0, %v4071_v26  ;;  %v1008_v29 = vrot.slane %v539_v24, %v2841_v13  ;;  %vm1010_vm4 = vcmp.eq.s32.totalorder %v2837_v12, %v1000_v22  ;;  %4142 = vst [vmem:[#allocation12_spill] sm:$0xff] %v2951_v17 }
  0x66   : > { %743 = vrot.lane.b32.xlu1 %v2750_v3, %s2609_s18  ;;  %745 = vrot.lane.b32.xlu0 %v2758_v4, %s2609_s18  ;;  %vm1015_vm2 = vcmp.eq.s32.totalorder %v992_v23, %v1004_v25  ;;  %v1038_v30 = vadd.f32 %v2865_v28, %v2862_v27  ;;  %v2876_v32 = vsel %vm1009_vm3, 1.0, %v4071_v26  ;;  %v2879_v33 = vsel %vm1010_vm4, 1.0, %v4071_v26 }
  0x67   : > { %v2873_v31 = vsel %vm1015_vm2, 1.0, %v4071_v26  ;;  %vm1016_vm5 = vcmp.eq.s32.totalorder %v992_v23, %v1008_v29  ;;  %vm1011_vm6 = vcmp.eq.s32.totalorder %v2837_v12, %v1004_v25  ;;  %v1033_v35 = vadd.f32 %v2879_v33, %v2876_v32 }
  0x68   : > { %v1039_v34 = vadd.f32 %v2873_v31, %v1038_v30  ;;  %v2886_v36 = vsel %vm1016_vm5, 1.0, %v4071_v26  ;;  %v2889_v37 = vsel %vm1011_vm6, 1.0, %v4071_v26  ;;  %vm1012_vm7 = vcmp.eq.s32.totalorder %v2837_v12, %v1008_v29 }
  0x69   : > { %v1034_v39 = vadd.f32 %v2889_v37, %v1033_v35  ;;  %v2895_v40 = vsel %vm1012_vm7, 1.0, %v4071_v26  ;;  %v628_v20 = vrot.slane %v2934_v6, %v2841_v13  ;;  %v653_v21 = vrot.slane %v2915_v55, %v648_v62 }
  0x6a   : > { %v1040_v38 = vadd.f32 %v2886_v36, %v1039_v34  ;;  %v2961_v22 = vrot.slane %v2909_v52, %v2841_v13  ;;  %v2968_v25 = vrot.slane %v2909_v52, %v673_v7  ;;  %v684_v29 = vrot.slane %v2915_v55, 1 }
  0x6b   : > { %v1035_v41 = vadd.f32 %v2895_v40, %v1034_v39  ;;  %v2974_v34 = vrot.slane %v2915_v55, %v673_v7  ;;  %v2977_v35 = vmul.f32 %v544_v9, %v2909_v52  ;;  %v2992_v62 = vmul.f32 %v683_v19, %v2909_v52 }
  0x6c   : > { %vm697_vm0 = vcmp.lt.s32.totalorder %v2922_v60, 113  ;;  %vm849_vm1 = vcmask 1045504   ;;  %vm4106_vm2 = vcmp.lt.s32.totalorder %v2922_v60, 112  ;;  %vm864_vm3 = vcmask 1046528  }
  0x6d   : > { %4143 = vst [vmem:[#allocation13_spill] sm:$0xff] %v2977_v35  ;;  %4144 = vst [vmem:[#allocation14_spill] sm:$0xff] %v2992_v62  ;;  %vm4104_vm4 = vcmask 1041408   ;;  %vm4105_vm5 = vcmask 1044480   ;;  %vm747_vm6 = vcmp.lt.s32.totalorder %v2922_v60, 111 }
  0x85   : > { %1041 = vadd.xlane.f32.xlu0 %v1040_v38  ;;  %v3009_v38 = vmul.f32 %v684_v29, %v2915_v55 }
  0x87   : > { %4146 = vst [vmem:[#allocation16_spill] sm:$0xff] %v3009_v38 }
  0x8a   : > { %1036 = vadd.xlane.f32.xlu1 %v1035_v41  ;;  %v2985_v41 = vrot.slane %v2951_v17, %v2841_v13 }
  0x94   : > { %v609_v42 = vpop.permute.xlu0 %608  ;;  %v634_v43 = vpop.permute.xlu1 %633 }
  0x98   : > { %v611_v44 = vpop.permute.xlu0 %610  ;;  %v615_v45 = vpop.permute.xlu1 %614 }
  0x99   : > { %v620_v30 = vsel %vm616_vm8, %v615_v45, %v609_v42  ;;  %v619_v1 = vsel %vm616_vm8, %v609_v42, %v611_v44 }
  0x9a   : > { %v3002_v26 = vmul.f32 %v624_v8, %v620_v30 }
  0x9c   : > { %v636_v46 = vpop.permute.xlu0 %635  ;;  %v640_v47 = vpop.permute.xlu1 %639 }
  0x9d   : > { %v645_v24 = vsel %vm641_vm9, %v640_v47, %v634_v43  ;;  %v644_v39 = vsel %vm641_vm9, %v634_v43, %v636_v46 }
  0x9e   : > { %v2996_v7 = vmul.f32 %v649_v10, %v645_v24  ;;  %v3011_v42 = vmul.f32 %v653_v21, %v644_v39 }
  0xa0   : > { %v2898_v48 = vpop.permute.xlu0 %577  ;;  %v2900_v49 = vpop.permute.xlu1 %579  ;;  %4145 = vst [vmem:[#allocation15_spill] sm:$0xff] %v2996_v7  ;;  %4147 = vst [vmem:[#allocation17_spill] sm:$0xff] %v3011_v42  ;;  %v792_v29 = vrot.slane %v2996_v7, 7  ;;  %v4152_v7 = vrot.slane %v3002_v26, 2 }
  0xa1   : > { %v588_v30 = vsel %vm585_vm10, %v2898_v48, %v2900_v49 }
  0xa4   : > { %v2902_v50 = vpop.permute.xlu0 %583 }
  0xa5   : > { %v589_v23 = vsel %vm585_vm10, %v2902_v50, %v2898_v48 }
  0xb1   : > { %v2904_v51 = vpop.permute.xlu1 %885 }
  0xb5   : > { %v613_v53 = vpop.permute.xlu1 %612  ;;  %v2911_v54 = vpop.permute.xlu0 %890 }
  0xb6   : > { %v617_v11 = vsel %vm616_vm8, %v613_v53, %v615_v45  ;;  %v618_v19 = vsel %vm616_vm8, %v611_v44, %v613_v53  ;;  %v3028_v53 = vrot.slane %v2992_v62, %v2844_v14 }
  0xb7   : > { %v3035_v39 = vmul.f32 %v624_v8, %v618_v19  ;;  %v3063_v19 = vmul.f32 %v2946_v15, %v588_v30  ;;  %v855_v30 = vsel %vm854_vm11, %v4152_v7, %v792_v29  ;;  %v3096_v29 = vmul.f32 %v2961_v22, %v589_v23 }
  0xb9   : > { %v638_v57 = vpop.permute.xlu1 %637  ;;  %v2918_v58 = vpop.permute.xlu0 %658  ;;  %4151 = vst [vmem:[#allocation21_spill] sm:$0xff] %v3063_v19 }
  0xba   : > { %v642_v43 = vsel %vm641_vm9, %v638_v57, %v640_v47  ;;  %v643_v9 = vsel %vm641_vm9, %v636_v46, %v638_v57  ;;  %v3015_v47 = vrot.slane %v2977_v35, %v2841_v13  ;;  %v3018_v46 = vmul.f32 %v628_v20, %v619_v1 }
  0xbb   : > { %v3020_v57 = vmul.f32 %v649_v10, %v643_v9  ;;  %v3022_v45 = vmul.f32 %v653_v21, %v642_v43  ;;  %v3037_v10 = vmul.f32 %v628_v20, %v617_v11  ;;  %v3042_v1 = vrot.slane %v3009_v38, %v2844_v14 }
  0xbc   : > { %4148 = vst [vmem:[#allocation18_spill] sm:$0xff] %v3018_v46  ;;  %v3047_v43 = vrot.slane %v2909_v52, %v2844_v14  ;;  %v793_v9 = vrot.slane %v3011_v42, 7  ;;  %v781_v52 = vrot.slane %v3018_v46, 2  ;;  %v4096_v42 = vrot.slane %v3035_v39, 2 }
  0xbd   : > { %v2928_v63 = vpop.permute.xlu1 %660  ;;  %v2930_v0 = vpop.permute.xlu0 %662  ;;  %4149 = vst [vmem:[#allocation19_spill] sm:$0xff] %v3020_v57  ;;  %4150 = vst [vmem:[#allocation20_spill] sm:$0xff] %v3022_v45  ;;  %v794_v21 = vrot.slane %v3020_v57, 7  ;;  %v795_v62 = vrot.slane %v3022_v45, 7 }
  0xbe   : > { %v669_v11 = vsel %vm666_vm12, %v2918_v58, %v2928_v63  ;;  %v668_v8 = vsel %vm666_vm12, %v2928_v63, %v2930_v0  ;;  %v856_v7 = vsel %vm854_vm11, %v781_v52, %v793_v9 }
  0xbf   : > { %v3082_v48 = vmul.f32 %v2968_v25, %v669_v11  ;;  %v3085_v57 = vmul.f32 %v2974_v34, %v668_v8  ;;  %v3100_v11 = vrot.slane %v2915_v55, %v2844_v14  ;;  %v3104_v8 = vrot.slane %v2977_v35, %v2844_v14 }
  0xc0   : > { %v857_v61 = vsel %vm854_vm11, %v4096_v42, %v794_v21  ;;  %v3117_v55 = vrot.slane %v2951_v17, %v2844_v14  ;;  %v4156_v35 = vrot.slane %v2747_v2, 4  ;;  %v861_v14 = vsel %vm859_vm14, %v856_v7, %v2762_v5 }
  0xc1   : > { %v2948_v16 = vpop.permute.xlu1 %550  ;;  %v2953_v18 = vpop.permute.xlu0 %552  ;;  %4153 = vst [vmem:[#allocation22_spill] sm:$0xff] %v3082_v48  ;;  %4154 = vst [vmem:[#allocation23_spill] sm:$0xff] %v3085_v57  ;;  %v813_v2 = vrot.slane %v3085_v57, 1  ;;  %v4157_v42 = vrot.slane %v2750_v3, 4 }
  0xc2   : > { %v563_v20 = vsel %vm560_vm13, %v2948_v16, %v2953_v18  ;;  %v860_v13 = vsel %vm859_vm14, %v855_v30, %v4156_v35  ;;  %v768_v35 = vrot.slane %v3096_v29, 5 }
  0xc3   : > { %v3088_v45 = vmul.f32 %v2985_v41, %v563_v20  ;;  %v769_v20 = vrot.slane %v3063_v19, 5  ;;  %v862_v7 = vsel %vm859_vm14, %v857_v61, %v4157_v42 }
  0xc5   : > { %v2987_v56 = vpop.permute.xlu1 %556  ;;  %v2989_v59 = vpop.permute.xlu0 %581 }
  0xc6   : > { %v564_v6 = vsel %vm560_vm13, %v2987_v56, %v2948_v16  ;;  %v4155_v16 = vrot.slane %v3037_v10, 2  ;;  %v586_v30 = vsel %vm585_vm10, %v2989_v59, %v2902_v50 }
  0xc7   : > { %v3123_v19 = vmul.f32 %v3015_v47, %v564_v6  ;;  %v846_v6 = vsel %vm844_vm15, %v3088_v45, %v769_v20  ;;  %v587_v20 = vsel %vm585_vm10, %v2900_v49, %v2989_v59 }
  0xc8   : > { %v858_v9 = vsel %vm854_vm11, %v4155_v16, %v795_v62  ;;  %v812_v16 = vrot.slane %v3082_v48, 1  ;;  %v851_v3 = vsel %vm849_vm1, %v846_v6, %v781_v52  ;;  %v3183_v6 = vmul.f32 %v2946_v15, %v586_v30 }
  0xc9   : > { %v3024_v44 = vpop.permute.xlu1 %689  ;;  %v692_v24 = vpop.permute.xlu0 %691  ;;  %v845_v61 = vsel %vm844_vm15, %v3123_v19, %v768_v35 }
  0xca   : > { %v700_v21 = vsel %vm697_vm0, %v3024_v44, %v692_v24  ;;  %v865_v42 = vsel %vm864_vm3, %v860_v13, %v812_v16 }
  0xcb   : > { %v3154_v57 = vmul.f32 %v3028_v53, %v700_v21  ;;  %v866_v21 = vsel %vm864_vm3, %v861_v14, %v813_v2  ;;  %v904_v14 = vmul.f32 %v2904_v51, %v851_v3 }
  0xcd   : > { %v3071_v38 = vpop.permute.xlu1 %693  ;;  %v3073_v63 = vpop.permute.xlu0 %895 }
  0xce   : > { %v699_v62 = vsel %vm697_vm0, %v692_v24, %v3071_v38  ;;  %v3144_v24 = vsel %vm859_vm14, %v858_v9, %v2758_v4 }
  0xcf   : > { %v3157_v48 = vmul.f32 %v3042_v1, %v699_v62  ;;  %v3180_v62 = vmul.f32 %v2961_v22, %v587_v20 }
  0xd1   : > { %v665_v23 = vpop.permute.xlu1 %664  ;;  %v3113_v46 = vpop.permute.xlu0 %714  ;;  %4158 = vst [vmem:[#allocation24_spill] sm:$0xff] %v3157_v48  ;;  %v825_v22 = vrot.slane %v3157_v48, 6 }
  0xd2   : > { %v667_v50 = vsel %vm666_vm12, %v2930_v0, %v665_v23  ;;  %v670_v0 = vsel %vm666_vm12, %v665_v23, %v2918_v58  ;;  %v4161_v58 = vrot.slane %v3002_v26, 2 }
  0xd3   : > { %v3186_v35 = vmul.f32 %v2968_v25, %v667_v50  ;;  %v3200_v30 = vmul.f32 %v2974_v34, %v670_v0  ;;  %v770_v0 = vrot.slane %v3180_v62, 5 }
  0xd4   : > { %v850_v23 = vsel %vm849_vm1, %v845_v61, %v4161_v58  ;;  %v907_v61 = vmul.f32 %v2911_v54, %v865_v42  ;;  %v771_v58 = vrot.slane %v3183_v6, 5 }
  0xd5   : > { %v717_v9 = vpop.permute.xlu1 %716  ;;  %v719_v17 = vpop.permute.xlu0 %718 }
  0xd6   : > { %v725_v49 = vsel %vm4106_vm2, %v3113_v46, %v717_v9  ;;  %v724_v59 = vsel %vm4106_vm2, %v717_v9, %v719_v17  ;;  %v824_v9 = vrot.slane %v3154_v57, 6 }
  0xd7   : > { %v3176_v52 = vmul.f32 %v3047_v43, %v725_v49  ;;  %v3189_v13 = vmul.f32 %v3100_v11, %v724_v59  ;;  %v908_v49 = vmul.f32 %v2911_v54, %v866_v21  ;;  %v871_v21 = vsel %vm4104_vm4, %v813_v2, %v825_v22 }
  0xd8   : > { %v870_v42 = vsel %vm4104_vm4, %v812_v16, %v824_v9 }
  0xd9   : > { %4159 = vst [vmem:[#allocation25_spill] sm:$0xff] %v3176_v52  ;;  %4160 = vst [vmem:[#allocation26_spill] sm:$0xff] %v3189_v13  ;;  %v3197_v20 = vpop.permute.xlu1 %900  ;;  %v555_v15 = vpop.permute.xlu0 %554  ;;  %v836_v25 = vrot.slane %v3176_v52, 3  ;;  %v837_v52 = vrot.slane %v3189_v13, 3 }
  0xda   : > { %v561_v50 = vsel %vm560_vm13, %v555_v15, %v2987_v56  ;;  %v562_v3 = vsel %vm560_vm13, %v2953_v18, %v555_v15  ;;  %v814_v56 = vrot.slane %v3186_v35, 1  ;;  %v903_v18 = vmul.f32 %v2904_v51, %v850_v23 }
  0xdb   : > { %v3212_v59 = vmul.f32 %v3015_v47, %v562_v3  ;;  %v3215_v34 = vmul.f32 %v2985_v41, %v561_v50  ;;  %v929_v3 = vadd.f32 %v908_v49, %v904_v14  ;;  %v815_v41 = vrot.slane %v3200_v30, 1 }
  0xdc   : > { %v875_v50 = vsel %vm4105_vm5, %v870_v42, %v836_v25  ;;  %v867_v9 = vsel %vm864_vm3, %v862_v7, %v814_v56 }
  0xdd   : > { %v696_v15 = vpop.permute.xlu1 %695  ;;  %v721_v47 = vpop.permute.xlu0 %720  ;;  %v847_v16 = vsel %vm844_vm15, %v3212_v59, %v770_v0  ;;  %v848_v2 = vsel %vm844_vm15, %v3215_v34, %v771_v58 }
  0xde   : > { %v698_v48 = vsel %vm697_vm0, %v3071_v38, %v696_v15  ;;  %v701_v13 = vsel %vm697_vm0, %v696_v15, %v3024_v44  ;;  %v876_v38 = vsel %vm4105_vm5, %v871_v21, %v837_v52  ;;  %v723_v22 = vsel %vm4106_vm2, %v719_v17, %v721_v47 }
  0xdf   : > { %v3237_v14 = vmul.f32 %v3028_v53, %v698_v48  ;;  %v3240_v23 = vmul.f32 %v3042_v1, %v701_v13  ;;  %v726_v44 = vsel %vm4106_vm2, %v721_v47, %v3113_v46  ;;  %v3252_v53 = vmul.f32 %v3047_v43, %v723_v22 }
  0xe0   : > { %v3255_v1 = vmul.f32 %v3100_v11, %v726_v44  ;;  %v911_v52 = vmul.f32 %v3073_v63, %v875_v50  ;;  %v4162_v17 = vrot.slane %v3035_v39, 2  ;;  %v4163_v46 = vrot.slane %v3037_v10, 2 }
  0xe1   : > { %v826_v25 = vrot.slane %v3237_v14, 6  ;;  %v827_v49 = vrot.slane %v3240_v23, 6  ;;  %v740_v48 = vpop.permute.xlu1 %739  ;;  %v742_v7 = vpop.permute.xlu0 %741  ;;  %v838_v42 = vrot.slane %v3252_v53, 3  ;;  %v868_v15 = vsel %vm864_vm3, %v3144_v24, %v815_v41 }
  0xe2   : > { %v852_v13 = vsel %vm849_vm1, %v847_v16, %v4162_v17  ;;  %v853_v0 = vsel %vm849_vm1, %v848_v2, %v4163_v46  ;;  %v750_v58 = vsel %vm747_vm6, %v740_v48, %v742_v7  ;;  %v839_v21 = vrot.slane %v3255_v1, 3 }
  0xe3   : > { %v872_v43 = vsel %vm4104_vm4, %v814_v56, %v826_v25  ;;  %v873_v11 = vsel %vm4104_vm4, %v815_v41, %v827_v49  ;;  %v909_v47 = vmul.f32 %v2911_v54, %v867_v9  ;;  %v919_v50 = vadd.f32 %v907_v61, %v903_v18 }
  0xe4   : > { %v3274_v16 = vmul.f32 %v3104_v8, %v750_v58  ;;  %v912_v2 = vmul.f32 %v3073_v63, %v876_v38  ;;  %v905_v22 = vmul.f32 %v2904_v51, %v852_v13  ;;  %v877_v56 = vsel %vm4105_vm5, %v872_v43, %v838_v42 }
  0xe5   : > { %v878_v44 = vsel %vm4105_vm5, %v873_v11, %v839_v21  ;;  %v744_v25 = vpop.permute.xlu1 %743  ;;  %v746_v49 = vpop.permute.xlu0 %745  ;;  %v906_v17 = vmul.f32 %v2904_v51, %v853_v0  ;;  %v920_v46 = vadd.f32 %v919_v50, %v911_v52  ;;  %v913_v18 = vmul.f32 %v3073_v63, %v877_v56 }
  0xe6   : > { %v915_v24 = vmul.f32 %v3197_v20, %v3274_v16  ;;  %v749_v61 = vsel %vm747_vm6, %v742_v7, %v744_v25  ;;  %v748_v9 = vsel %vm747_vm6, %v744_v25, %v746_v49  ;;  %v751_v38 = vsel %vm747_vm6, %v746_v49, %v740_v48 }
  0xe7   : > { %v3287_v41 = vmul.f32 %v3117_v55, %v749_v61  ;;  %v910_v51 = vmul.f32 %v2911_v54, %v868_v15  ;;  %v914_v52 = vmul.f32 %v3073_v63, %v878_v44  ;;  %v3297_v0 = vmul.f32 %v3104_v8, %v748_v9 }
  0xe8   : > { %v921_v13 = vsel %vm844_vm15, %v915_v24, 0.0  ;;  %v939_v43 = vadd.f32 %v909_v47, %v905_v22  ;;  %v3302_v11 = vmul.f32 %v3117_v55, %v751_v38  ;;  %v930_v42 = vadd.f32 %v929_v3, %v912_v2 }
  0xe9   : > { %v922_v7 = vadd.f32 %v921_v13, %v920_v46  ;;  %v916_v58 = vmul.f32 %v3197_v20, %v3287_v41  ;;  %v949_v21 = vadd.f32 %v910_v51, %v906_v17  ;;  %v917_v54 = vmul.f32 %v3197_v20, %v3297_v0 }
  0xea   : > { %v940_v15 = vadd.f32 %v939_v43, %v913_v18  ;;  %v918_v8 = vmul.f32 %v3197_v20, %v3302_v11  ;;  %v961_v13 = vstv %s2438_s24  ;;  %s495_s24 = scalar_lea.vmem %s4053_s10, %s2372_s23  ;;  %s508_s23 = scalar_lea.vmem %s4055_s12, %s2738_s22 }
  0xeb   : > { %v923_v48 = vrot.slane %v922_v7, 4  ;;  %v931_v63 = vsel %vm844_vm15, %v916_v58, 0.0  ;;  %v950_v56 = vadd.f32 %v949_v21, %v914_v52  ;;  %v941_v44 = vsel %vm844_vm15, %v917_v54, 0.0 }
  0xec   : > { %v932_v50 = vadd.f32 %v931_v63, %v930_v42  ;;  %v942_v47 = vadd.f32 %v941_v44, %v940_v15  ;;  %v951_v55 = vsel %vm844_vm15, %v918_v8, 0.0 }
  0xed   : > { %v924_v22 = vadd.f32 %v923_v48, %v922_v7  ;;  %v952_v2 = vadd.f32 %v951_v55, %v950_v56 }
  0xee   : > { %v933_v3 = vrot.slane %v932_v50, 4  ;;  %v943_v25 = vrot.slane %v942_v47, 4 }
  0xef   : > { %v925_v49 = vrot.slane %v924_v22, 2  ;;  %v953_v17 = vrot.slane %v952_v2, 4 }
  0xf0   : > { %v934_v46 = vadd.f32 %v933_v3, %v932_v50  ;;  %v944_v61 = vadd.f32 %v943_v25, %v942_v47 }
  0xf1   : > { %v926_v24 = vadd.f32 %v925_v49, %v924_v22  ;;  %v954_v9 = vadd.f32 %v953_v17, %v952_v2 }
  0xf2   : > { %v935_v18 = vrot.slane %v934_v46, 2  ;;  %v945_v38 = vrot.slane %v944_v61, 2 }
  0xf3   : > { %v927_v20 = vrot.slane %v926_v24, 1  ;;  %v955_v52 = vrot.slane %v954_v9, 2 }
  0xf4   : > { %v936_v51 = vadd.f32 %v935_v18, %v934_v46  ;;  %v946_v43 = vadd.f32 %v945_v38, %v944_v61 }
  0xf5   : > { %v928_v58 = vadd.f32 %v927_v20, %v926_v24  ;;  %v956_v7 = vadd.f32 %v955_v52, %v954_v9 }
  0xf6   : > { %v937_v42 = vrot.slane %v936_v51, 1  ;;  %v947_v21 = vrot.slane %v946_v43, 1 }
  0xf7   : > { %v962_v54 = vadd.f32 %v961_v13, %v928_v58  ;;  %v957_v63 = vrot.slane %v956_v7, 1 }
  0xf8   : > { %v938_v48 = vadd.f32 %v937_v42, %v936_v51  ;;  %v948_v15 = vadd.f32 %v947_v21, %v946_v43 }
  0xf9   : > { %v2382_v8 = vmul.f32 -1.442695, %v962_v54  ;;  %v958_v50 = vadd.f32 %v957_v63, %v956_v7  ;;  %v1047_v47 = vmul.f32 %v2862_v27, %v962_v54  ;;  %v1043_v49 = vmul.f32 %v2876_v32, %v962_v54 }
  0xfa   : > { %v963_v56 = vadd.f32 %v961_v13, %v938_v48  ;;  %v964_v44 = vadd.f32 %v961_v13, %v948_v15  ;;  %v2611_v15 = vmov 1966171168  }
  0xfb   : > { %2494 = vpow2.f32 %v2382_v8  ;;  %v965_v55 = vadd.f32 %v961_v13, %v958_v50  ;;  %v2066_v8 = vunpack.c.l.s4 %v2611_v15 }
  0xfc   : > { %v2383_v22 = vmul.f32 -1.442695, %v963_v56  ;;  %v1048_v3 = vmul.f32 %v2865_v28, %v963_v56  ;;  %v1044_v2 = vmul.f32 %v2879_v33, %v963_v56  ;;  %v2384_v25 = vmul.f32 -1.442695, %v964_v44 }
  0xfd   : > { %v2385_v17 = vmul.f32 -1.442695, %v965_v55  ;;  %v1049_v46 = vmul.f32 %v2873_v31, %v964_v44  ;;  %v1045_v61 = vmul.f32 %v2889_v37, %v964_v44  ;;  %v1050_v9 = vmul.f32 %v2886_v36, %v965_v55 }
  0xfe   : > { %2496 = vpow2.f32 %v2383_v22  ;;  %v1056_v24 = vadd.f32 %v1048_v3, %v1047_v47  ;;  %v1051_v18 = vadd.f32 %v1044_v2, %v1043_v49  ;;  %v1046_v38 = vmul.f32 %v2895_v40, %v965_v55 }
  0xff   : > { %2498 = vpow2.f32 %v2384_v25  ;;  %v2067_v50 = vunpack.c.0.s8 %v2066_v8  ;;  %v4164_v49 = vlaneseq }
 0x100   : > { %2500 = vpow2.f32 %v2385_v17  ;;  %v1057_v20 = vadd.f32 %v1056_v24, %v1049_v46  ;;  %v1052_v51 = vadd.f32 %v1051_v18, %v1045_v61 }
 0x101   : > { %v2070_v44 = vsub.s32 %v2067_v50, %v2837_v12  ;;  %vm2082_vm7 = vcmp.lt.s32.totalorder %v4164_v49, 256 }
 0x102   : > { %v1058_v52 = vadd.f32 %v1057_v20, %v1050_v9  ;;  %v1053_v13 = vadd.f32 %v1052_v51, %v1046_v38 }
 0x104   : > { %1059 = vadd.xlane.f32.xlu1 %v1058_v52  ;;  %1054 = vadd.xlane.f32.xlu0 %v1053_v13 }
 0x105   : > { %v2495_v58 = vpop.eup %2494 }
 0x106   : > { %v978_v43 = vadd.f32 1.0, %v2495_v58 }
 0x108   : > { %v2497_v42 = vpop.eup %2496  ;;  %2502 = vrcp.f32 %v978_v43 }
 0x109   : > { %v2499_v7 = vpop.eup %2498  ;;  %v979_v21 = vadd.f32 1.0, %v2497_v42 }
 0x10a   : > { %v2501_v54 = vpop.eup %2500  ;;  %v980_v48 = vadd.f32 1.0, %v2499_v7 }
 0x10b   : > { %v981_v63 = vadd.f32 1.0, %v2501_v54  ;;  %2504 = vrcp.f32 %v979_v21 }
 0x10c   : > { %2506 = vrcp.f32 %v980_v48 }
 0x10d   : > { %2508 = vrcp.f32 %v981_v63 }
 0x112   : > { %v2503_v56 = vpop.eup %2502  ;;  %v1042_v61 = vpop.xlane.xlu0 %1041 }
 0x113   : > { %v1064_v18 = vmax.f32 %v1042_v61, 1.0  ;;  %vm1062_vm4 = vcmp.gt.f32.partialorder %v1042_v61, 0.0 }
 0x115   : > { %v2505_v47 = vpop.eup %2504  ;;  %2510 = vrcp.f32 %v1064_v18 }
 0x116   : > { %v2507_v55 = vpop.eup %2506  ;;  %v2064_v22 = vcombine.low %v2503_v56, %v2505_v47  ;;  %v4165_v56 = vmov 0.0  }
 0x117   : > { %v2509_v3 = vpop.eup %2508  ;;  %v1037_v12 = vpop.xlane.xlu1 %1036 }
 0x118   : > { %v2147_v2 = vcombine.low %v2507_v55, %v2509_v3  ;;  %v2071_v25 = vrot.slane %v2064_v22, %v2070_v44  ;;  %v1063_v9 = vmax.f32 %v1037_v12, 1.0  ;;  %vm1061_vm5 = vcmp.gt.f32.partialorder %v1037_v12, 0.0 }
 0x11a   : > { %v2154_v17 = vrot.slane %v2147_v2, %v2070_v44  ;;  %v2078_v46 = vrot.slane %v2071_v25, %v2070_v44  ;;  %2512 = vrcp.f32 %v1063_v9 }
 0x11c   : > { %2084 = vst.msk [vmem:[%s495_s24] sm:$0x3] %vm2082_vm7, %v2078_v46  ;;  %v2161_v24 = vrot.slane %v2154_v17, %v2070_v44 }
 0x11e   : > { %2411 = vst.msk [vmem:[%s495_s24 + $0x2] sm:$0x3] %vm2082_vm7, %v2161_v24  ;;  %vm1083_vm7 = vcmask 7168   ;;  %s4172_s24 = smov 112  }
 0x11f   : > { %v2511_v20 = vpop.eup %2510 }
 0x124   : > { %v2513_v38 = vpop.eup %2512 }
 0x191   : > { %v1060_v51 = vpop.xlane.xlu1 %1059  ;;  %v1055_v13 = vpop.xlane.xlu0 %1054 }
 0x192   : > { %v1068_v52 = vmul.f32 %v2511_v20, %v1060_v51  ;;  %v1066_v58 = vmul.f32 %v2513_v38, %v1055_v13 }
 0x194   : > { %v1070_v43 = vsel %vm1062_vm4, %v1068_v52, 0.0  ;;  %v1069_v7 = vsel %vm1061_vm5, %v1066_v58, 0.0 }
 0x195   : > { %v2395_v42 = vmul.f32 -1.442695, %v1070_v43  ;;  %v2394_v21 = vmul.f32 -1.442695, %v1069_v7 }
 0x197   : > { %2514 = vpow2.f32 %v2395_v42 }
 0x198   : > { %2516 = vpow2.f32 %v2394_v21 }
 0x1a1   : > { %v2515_v54 = vpop.eup %2514 }
 0x1a2   : > { %v2517_v48 = vpop.eup %2516  ;;  %v1078_v63 = vadd.f32 1.0, %v2515_v54 }
 0x1a3   : > { %v1077_v15 = vadd.f32 1.0, %v2517_v48 }
 0x1a4   : > { %2518 = vrcp.f32 %v1078_v63 }
 0x1a5   : > { %2520 = vrcp.f32 %v1077_v15 }
 0x1ae   : > { %v2519_v8 = vpop.eup %2518 }
 0x1af   : > { %v2521_v50 = vpop.eup %2520  ;;  %vm1087_vm2 = vcmp.gt.f32.partialorder %v2519_v8, 0.5  ;;  %1085 = vst.msk [vmem:[%s501_s17 + $0x8] sm:$0xff] %vm1083_vm7, %v2519_v8 }
 0x1b0   : > { %v2397_v44 = vsel %vm1087_vm2, 1.0, %v4165_v56  ;;  %1084 = vst.msk [vmem:[%s501_s17] sm:$0xff] %vm1083_vm7, %v2521_v50  ;;  %vm1086_vm4 = vcmp.gt.f32.partialorder %v2521_v50, 0.5  ;;  %v1762_v50 = vld [vmem:[%s4050_s7] sm:$0xff]  ;;  %s475_s17 = sand.u32 1, %s2591_s28  }
 0x1b1   : > { %v1096_v47 = vmul.f32 %v2397_v44, %v2862_v27  ;;  %v1097_v55 = vmul.f32 %v2397_v44, %v2865_v28  ;;  %v1098_v22 = vmul.f32 %v2397_v44, %v2873_v31  ;;  %v1099_v3 = vmul.f32 %v2397_v44, %v2886_v36  ;;  %v1763_v44 = vld [vmem:[%s4050_s7 + $0x8] sm:$0xff] }
 0x1b2   : > { %v2396_v2 = vsel %vm1086_vm4, 1.0, %v4165_v56 }
 0x1b3   : > { %v1092_v25 = vmul.f32 %v2396_v2, %v2876_v32  ;;  %v1093_v49 = vmul.f32 %v2396_v2, %v2879_v33  ;;  %v1094_v17 = vmul.f32 %v2396_v2, %v2889_v37  ;;  %v1095_v46 = vmul.f32 %v2396_v2, %v2895_v40 }
 0x1b5   : > { %v1100_v24 = vadd.f32 %v1096_v47, %v1092_v25  ;;  %v1107_v61 = vadd.f32 %v1097_v55, %v1093_v49  ;;  %v1114_v27 = vadd.f32 %v1098_v22, %v1094_v17  ;;  %v1121_v12 = vadd.f32 %v1099_v3, %v1095_v46  ;;  %v1764_v47 = vld [vmem:[%s4050_s7 + $0x10] sm:$0xff]  ;;  %v1765_v55 = vld [vmem:[%s4050_s7 + $0x18] sm:$0xff]  ;;  %v4173_v25 = vld [vmem:[#allocation7_spill] sm:$0xff] }
 0x1b7   : > { %v1101_v28 = vrot.slane %v1100_v24, 4  ;;  %v1108_v18 = vrot.slane %v1107_v61, 4  ;;  %v1115_v31 = vrot.slane %v1114_v27, 4  ;;  %v1122_v9 = vrot.slane %v1121_v12, 4 }
 0x1b9   : > { %v1102_v36 = vadd.f32 %v1101_v28, %v1100_v24  ;;  %v1109_v20 = vadd.f32 %v1108_v18, %v1107_v61  ;;  %v1116_v38 = vadd.f32 %v1115_v31, %v1114_v27  ;;  %v1123_v51 = vadd.f32 %v1122_v9, %v1121_v12  ;;  %v2534_v12 = vld [vmem:[%s2744_s25 + $0x8] sm:$0x77]  ;;  %v4183_v18 = vld [vmem:[#allocation9_spill] sm:$0xff] }
 0x1bb   : > { %v1103_v52 = vrot.slane %v1102_v36, 2  ;;  %v1110_v32 = vrot.slane %v1109_v20, 2  ;;  %v1117_v13 = vrot.slane %v1116_v38, 2  ;;  %v1124_v33 = vrot.slane %v1123_v51, 2 }
 0x1bd   : > { %v1104_v58 = vadd.f32 %v1103_v52, %v1102_v36  ;;  %v1111_v37 = vadd.f32 %v1110_v32, %v1109_v20  ;;  %v1118_v43 = vadd.f32 %v1117_v13, %v1116_v38  ;;  %v1125_v40 = vadd.f32 %v1124_v33, %v1123_v51  ;;  %v2535_v36 = vld [vmem:[%s2744_s25] sm:$0x77] }
 0x1be   : > { %v4178_v51 = vld [vmem:[#allocation11_spill] sm:$0xff] }
 0x1bf   : > { %v1105_v42 = vrot.slane %v1104_v58, 1  ;;  %v1112_v7 = vrot.slane %v1111_v37, 1  ;;  %v1119_v48 = vrot.slane %v1118_v43, 1  ;;  %v1126_v63 = vrot.slane %v1125_v40, 1 }
 0x1c1   : > { %v3340_v21 = vadd.f32 %v1105_v42, %v1104_v58  ;;  %v3342_v54 = vadd.f32 %v1112_v7, %v1111_v37  ;;  %v3348_v15 = vadd.f32 %v1119_v48, %v1118_v43  ;;  %v3350_v8 = vadd.f32 %v1126_v63, %v1125_v40  ;;  %v4179_v42 = vld [vmem:[#allocation10_spill] sm:$0xff] }
 0x1c3   : > { %4166 = vst [vmem:[#allocation27_spill] sm:$0xff] %v3340_v21  ;;  %1232 = vrot.lane.b32.xlu1 %v3342_v54, %s4133_s26  ;;  %1230 = vrot.lane.b32.xlu0 %v3340_v21, %s4133_s26  ;;  %4167 = vst [vmem:[#allocation28_spill] sm:$0xff] %v3348_v15  ;;  %v3429_v61 = vmul.f32 %v3342_v54, %v2762_v5  ;;  %v3433_v27 = vmul.f32 %v3350_v8, %v2758_v4  ;;  %v4177_v4 = vld [vmem:[#allocation18_spill] sm:$0xff] }
 0x1c4   : > { %4168 = vst [vmem:[#allocation29_spill] sm:$0xff] %v3350_v8  ;;  %v3437_v28 = vmul.f32 %v2534_v12, %v3348_v15  ;;  %v3448_v20 = vmul.f32 %v2535_v36, %v3340_v21 }
 0x1c5   : > { %4174 = vst [vmem:[#allocation7_spill] sm:$0xff] %v3429_v61  ;;  %4175 = vst [vmem:[#allocation30_spill] sm:$0xff] %v3433_v27 }
 0x1c6   : > { %4176 = vst [vmem:[#allocation31_spill] sm:$0xff] %v3437_v28 }
 0x1c7   : > { %1234 = vrot.lane.b32.xlu1 %v3348_v15, %s4133_s26  ;;  %1236 = vrot.lane.b32.xlu0 %v3350_v8, %s4133_s26  ;;  %s4170_s26 = smov 127  }
 0x1cb   : > { %1270 = vrot.lane.b32.xlu1 %v3340_v21, %s4134_s0  ;;  %1272 = vrot.lane.b32.xlu0 %v3342_v54, %s4134_s0 }
 0x1cf   : > { %1274 = vrot.lane.b32.xlu1 %v3348_v15, %s4134_s0  ;;  %1276 = vrot.lane.b32.xlu0 %v3350_v8, %s4134_s0 }
 0x1d3   : > { %1190 = vrot.lane.b32.xlu1 %v3340_v21, %s4169_s14  ;;  %1192 = vrot.lane.b32.xlu0 %v3342_v54, %s4169_s14 }
 0x1d7   : > { %1194 = vrot.lane.b32.xlu1 %v3348_v15, %s4169_s14  ;;  %1196 = vrot.lane.b32.xlu0 %v3350_v8, %s4169_s14 }
 0x1db   : > { %1150 = vrot.lane.b32.xlu1 %v3340_v21, %s4135_s16  ;;  %1152 = vrot.lane.b32.xlu0 %v3342_v54, %s4135_s16 }
 0x1df   : > { %1154 = vrot.lane.b32.xlu1 %v3348_v15, %s4135_s16  ;;  %1156 = vrot.lane.b32.xlu0 %v3350_v8, %s4135_s16  ;;  %s4171_s16 = smov 113  }
 0x1e3   : > { %1322 = vrot.lane.b32.xlu1 %v3340_v21, %s4170_s26  ;;  %1324 = vrot.lane.b32.xlu0 %v3342_v54, %s4170_s26 }
 0x1e7   : > { %1326 = vrot.lane.b32.xlu1 %v3348_v15, %s4170_s26  ;;  %1328 = vrot.lane.b32.xlu0 %v3350_v8, %s4170_s26  ;;  %s2367_s26 = sshll.u32 %s475_s17, 1 }
 0x1e8   : > { %s477_s1 = scalar_lea.vmem [#allocation3], %s2367_s26 }
 0x1e9   : > { %s2213_s3 = sshll.u32 %s477_s1, 4  ;;  %s3995_s3 = int_to_ptr.vmem [resolvable:$true] %s2213_s3 }
 0x1eb   : > { %1478 = vrot.lane.b32.xlu1 %v3340_v21, %s2609_s18  ;;  %1480 = vrot.lane.b32.xlu0 %v3342_v54, %s2609_s18 }
 0x1ef   : > { %1482 = vrot.lane.b32.xlu1 %v3348_v15, %s2609_s18  ;;  %1484 = vrot.lane.b32.xlu0 %v3350_v8, %s2609_s18  ;;  %s2537_s18 = scalar_lea.vmem %s3995_s3, 32 }
 0x1f0   : > { %p2538_p11 = scmp.ne.s32.totalorder %s3995_s3, %s2537_s18 }
 0x1f2   : > { %p2539_p12 = pnand %p2538_p11, %p2724_p5 }
 0x1f3   : > { %1374 = vrot.lane.b32.xlu1 %v3340_v21, %s4171_s16  ;;  %1376 = vrot.lane.b32.xlu0 %v3342_v54, %s4171_s16 }
 0x1f4   : > { %p2540_p13 = pneg %p2539_p12 }
 0x1f7   : > { %1378 = vrot.lane.b32.xlu1 %v3348_v15, %s4171_s16  ;;  %1380 = vrot.lane.b32.xlu0 %v3350_v8, %s4171_s16  ;;  %s2420_s16 = sshll.u32 %s2707_s4, 5  ;;  %s3999_s4 = scalar_lea.sflag [#allocation4], %s475_s17 }
 0x1fb   : > { %1426 = vrot.lane.b32.xlu1 %v3340_v21, %s4172_s24  ;;  %1428 = vrot.lane.b32.xlu0 %v3342_v54, %s4172_s24 }
 0x1ff   : > { %1430 = vrot.lane.b32.xlu1 %v3348_v15, %s4172_s24  ;;  %1432 = vrot.lane.b32.xlu0 %v3350_v8, %s4172_s24  ;;  %s3993_s24 = scalar_lea.hbm %s4056_s13, %s2420_s16 }
 0x203   : > { %1768 = vperm.xlu1 %2489, %v1762_v50   ;;  %1773 = vperm.xlu0 %2490, %v1763_v44  }
 0x207   : > { %1778 = vperm.xlu1 %2489, %v1764_v47   ;;  %1783 = vperm.xlu0 %2490, %v1765_v55   ;;  %v1571_v55 = vrot.slane %v3429_v61, 4 }
 0x235   : > { %v1233_v22 = vpop.permute.xlu1 %1232  ;;  %v1231_v3 = vpop.permute.xlu0 %1230 }
 0x236   : > { %v1240_v2 = vsel %vm616_vm8, %v1231_v3, %v1233_v22 }
 0x237   : > { %v1249_v49 = vrot.slane %v1240_v2, %v4173_v25  ;;  %v1263_v17 = vsub.f32 1.0, %v1240_v2 }
 0x239   : > { %v1235_v46 = vpop.permute.xlu1 %1234  ;;  %v1237_v24 = vpop.permute.xlu0 %1236  ;;  %v3451_v38 = vmul.f32 %v1249_v49, %v4177_v4  ;;  %v3454_v52 = vmul.f32 %v1263_v17, %v4178_v51 }
 0x23a   : > { %v1239_v31 = vsel %vm616_vm8, %v1233_v22, %v1235_v46  ;;  %v1238_v9 = vsel %vm616_vm8, %v1235_v46, %v1237_v24  ;;  %v1241_v5 = vsel %vm616_vm8, %v1237_v24, %v1231_v3  ;;  %v4187_v22 = vld [vmem:[#allocation8_spill] sm:$0xff]  ;;  %vm4221_vm8 = vcmp.lt.s32.totalorder %v2922_v60, 112 }
 0x23b   : > { %v1253_v32 = vrot.slane %v1239_v31, %v4173_v25  ;;  %v1264_v13 = vsub.f32 1.0, %v1239_v31  ;;  %v1245_v33 = vrot.slane %v1241_v5, %v4173_v25  ;;  %v1257_v58 = vrot.slane %v1238_v9, %v4173_v25 }
 0x23c   : > { %v1262_v37 = vsub.f32 1.0, %v1241_v5  ;;  %v1265_v43 = vsub.f32 1.0, %v1238_v9 }
 0x23d   : > { %v3460_v40 = vmul.f32 %v1253_v32, %v3035_v39  ;;  %v3463_v7 = vmul.f32 %v1264_v13, %v4179_v42  ;;  %v1271_v48 = vpop.permute.xlu1 %1270  ;;  %v1273_v63 = vpop.permute.xlu0 %1272  ;;  %v3468_v47 = vmul.f32 %v1245_v33, %v3002_v26  ;;  %v4107_v39 = vrot.slane %v3451_v38, 2 }
 0x23e   : > { %v1280_v2 = vsel %vm641_vm9, %v1271_v48, %v1273_v63  ;;  %v3480_v26 = vmul.f32 %v1257_v58, %v3037_v10  ;;  %v3483_v24 = vmul.f32 %v1262_v37, %v4179_v42  ;;  %v3486_v12 = vmul.f32 %v1265_v43, %v4178_v51  ;;  %v4182_v58 = vld [vmem:[#allocation17_spill] sm:$0xff] }
 0x23f   : > { %4180 = vst [vmem:[#allocation18_spill] sm:$0xff] %v3463_v7  ;;  %v1289_v5 = vrot.slane %v1280_v2, %v4173_v25  ;;  %v1303_v36 = vsub.f32 1.0, %v1280_v2 }
 0x240   : > { %4181 = vst [vmem:[#allocation11_spill] sm:$0xff] %v3483_v24 }
 0x241   : > { %v1275_v4 = vpop.permute.xlu1 %1274  ;;  %v1277_v32 = vpop.permute.xlu0 %1276  ;;  %v1299_v37 = vmul.f32 %v1289_v5, %v4182_v58  ;;  %v1311_v43 = vrot.slane %v1303_v36, 6 }
 0x242   : > { %v1279_v10 = vsel %vm641_vm9, %v1273_v63, %v1275_v4  ;;  %v1278_v33 = vsel %vm641_vm9, %v1275_v4, %v1277_v32  ;;  %v1281_v51 = vsel %vm641_vm9, %v1277_v32, %v1271_v48  ;;  %v4184_v4 = vld [vmem:[#allocation19_spill] sm:$0xff]  ;;  %vm4224_vm9 = vcmask 1044480  }
 0x243   : > { %v1293_v42 = vrot.slane %v1279_v10, %v4173_v25  ;;  %v1304_v3 = vsub.f32 1.0, %v1279_v10  ;;  %v1285_v2 = vrot.slane %v1281_v51, %v4173_v25  ;;  %v1297_v44 = vrot.slane %v1278_v33, %v4173_v25  ;;  %v4185_v32 = vld [vmem:[#allocation15_spill] sm:$0xff]  ;;  %v4186_v10 = vld [vmem:[#allocation20_spill] sm:$0xff] }
 0x244   : > { %v1302_v9 = vsub.f32 1.0, %v1281_v51  ;;  %v1305_v50 = vsub.f32 1.0, %v1278_v33  ;;  %v3504_v46 = vmul.f32 %v1311_v43, %v4183_v18  ;;  %v1559_v51 = vrot.slane %v1299_v37, 7 }
 0x245   : > { %v3507_v17 = vmul.f32 %v1293_v42, %v4184_v4  ;;  %v1312_v48 = vrot.slane %v1304_v3, 6  ;;  %v1191_v5 = vpop.permute.xlu1 %1190  ;;  %v1193_v36 = vpop.permute.xlu0 %1192  ;;  %v3510_v58 = vmul.f32 %v1285_v2, %v4185_v32  ;;  %v1301_v13 = vmul.f32 %v1297_v44, %v4186_v10 }
 0x246   : > { %v1310_v49 = vrot.slane %v1302_v9, 6  ;;  %v1313_v31 = vrot.slane %v1305_v50, 6  ;;  %v1200_v43 = vsel %vm585_vm10, %v1191_v5, %v1193_v36 }
 0x247   : > { %v3515_v63 = vmul.f32 %v1312_v48, %v4187_v22  ;;  %v1560_v2 = vrot.slane %v3507_v17, 7  ;;  %v1209_v9 = vrot.slane %v1200_v43, %v4173_v25  ;;  %v1223_v37 = vsub.f32 1.0, %v1200_v43 }
 0x248   : > { %v3523_v4 = vmul.f32 %v1310_v49, %v4187_v22  ;;  %v3526_v50 = vmul.f32 %v1313_v31, %v4183_v18  ;;  %v1561_v33 = vrot.slane %v1301_v13, 7  ;;  %v4191_v49 = vld [vmem:[#allocation21_spill] sm:$0xff]  ;;  %v1683_v43 = vsel %vm854_vm11, %v4107_v39, %v1559_v51  ;;  %v3556_v51 = vld [vmem:[%s4045_s2] sm:$0xff] }
 0x249   : > { %4188 = vst [vmem:[#allocation10_spill] sm:$0xff] %v3515_v63  ;;  %v1195_v48 = vpop.permute.xlu1 %1194  ;;  %v1197_v32 = vpop.permute.xlu0 %1196  ;;  %v3536_v17 = vmul.f32 %v1209_v9, %v4191_v49  ;;  %v3543_v44 = vmul.f32 %v1223_v37, %v4183_v18  ;;  %v4192_v39 = vrot.slane %v3480_v26, 2 }
 0x24a   : > { %4189 = vst [vmem:[#allocation17_spill] sm:$0xff] %v3523_v4  ;;  %4190 = vst [vmem:[#allocation9_spill] sm:$0xff] %v3526_v50  ;;  %v1199_v3 = vsel %vm585_vm10, %v1193_v36, %v1195_v48  ;;  %v1198_v22 = vsel %vm585_vm10, %v1195_v48, %v1197_v32  ;;  %v1201_v13 = vsel %vm585_vm10, %v1197_v32, %v1191_v5 }
 0x24b   : > { %v1213_v31 = vrot.slane %v1199_v3, %v4173_v25  ;;  %v1224_v42 = vsub.f32 1.0, %v1199_v3  ;;  %v1217_v36 = vrot.slane %v1198_v22, %v4173_v25  ;;  %v1225_v10 = vsub.f32 1.0, %v1198_v22  ;;  %vm4225_vm10 = vmmov %vm4221_vm8 }
 0x24c   : > { %v1205_v32 = vrot.slane %v1201_v13, %v4173_v25  ;;  %v1222_v48 = vsub.f32 1.0, %v1201_v13  ;;  %v1685_v56 = vsel %vm854_vm11, %v4192_v39, %v1561_v33  ;;  %v4195_v13 = vrot.slane %v3460_v40, 2 }
 0x24d   : > { %v3551_v49 = vmul.f32 %v1213_v31, %v3180_v62  ;;  %v3559_v3 = vmul.f32 %v3556_v51, %v1224_v42  ;;  %v1151_v37 = vpop.permute.xlu1 %1150  ;;  %v1153_v5 = vpop.permute.xlu0 %1152  ;;  %v1221_v22 = vmul.f32 %v1217_v36, %v3183_v6  ;;  %v3564_v9 = vmul.f32 %v1225_v10, %v4183_v18 }
 0x24e   : > { %v1535_v62 = vrot.slane %v3536_v17, 5  ;;  %v1160_v31 = vsel %vm560_vm13, %v1151_v37, %v1153_v5  ;;  %v3572_v42 = vsel %vm859_vm14, %v1683_v43, %v1571_v55  ;;  %v3581_v17 = vmul.f32 %v1205_v32, %v3096_v29 }
 0x24f   : > { %v3584_v36 = vmul.f32 %v3556_v51, %v1222_v48  ;;  %v1537_v61 = vrot.slane %v1221_v22, 5  ;;  %v1169_v55 = vrot.slane %v1160_v31, %v4173_v25  ;;  %v1183_v43 = vsub.f32 1.0, %v1160_v31  ;;  %v4194_v22 = vld [vmem:[#allocation12_spill] sm:$0xff] }
 0x250   : > { %v4193_v29 = vrot.slane %v3433_v27, 4  ;;  %v1684_v39 = vsel %vm854_vm11, %v4195_v13, %v1560_v2 }
 0x251   : > { %v1155_v15 = vpop.permute.xlu1 %1154  ;;  %v1157_v63 = vpop.permute.xlu0 %1156  ;;  %v1179_v48 = vmul.f32 %v1169_v55, %v3088_v45  ;;  %v3599_v6 = vmul.f32 %v1183_v43, %v4194_v22  ;;  %v4196_v55 = vld [vmem:[#allocation13_spill] sm:$0xff] }
 0x252   : > { %v1159_v33 = vsel %vm560_vm13, %v1153_v5, %v1155_v15  ;;  %v1158_v10 = vsel %vm560_vm13, %v1155_v15, %v1157_v63  ;;  %v3595_v32 = vsel %vm859_vm14, %v1685_v56, %v4193_v29  ;;  %v1161_v15 = vsel %vm560_vm13, %v1157_v63, %v1151_v37  ;;  %vm4229_vm13 = vmmov %vm4221_vm8 }
 0x253   : > { %v1184_v31 = vsub.f32 1.0, %v1159_v33  ;;  %v1173_v5 = vrot.slane %v1159_v33, %v4173_v25  ;;  %v1177_v27 = vrot.slane %v1158_v10, %v4173_v25  ;;  %v1185_v21 = vsub.f32 1.0, %v1158_v10 }
 0x254   : > { %v1165_v29 = vrot.slane %v1161_v15, %v4173_v25  ;;  %v1182_v13 = vsub.f32 1.0, %v1161_v15  ;;  %v4202_v37 = vrot.slane %v3480_v26, 2 }
 0x255   : > { %v3611_v43 = vmul.f32 %v1184_v31, %v4196_v55  ;;  %v1323_v7 = vpop.permute.xlu1 %1322  ;;  %v1325_v4 = vpop.permute.xlu0 %1324  ;;  %v1181_v2 = vmul.f32 %v1177_v27, %v3215_v34  ;;  %v3616_v33 = vmul.f32 %v1185_v21, %v4194_v22  ;;  %v4197_v31 = vrot.slane %v3437_v28, 4 }
 0x256   : > { %v1332_v63 = vsel %vm666_vm12, %v1323_v7, %v1325_v4  ;;  %v1180_v24 = vmul.f32 %v1173_v5, %v3212_v59  ;;  %v3630_v21 = vmul.f32 %v1165_v29, %v3123_v19  ;;  %v1675_v27 = vsel %vm844_vm15, %v1179_v48, %v1535_v62 }
 0x257   : > { %v1337_v10 = vrot.slane %v1332_v63, %v4173_v25  ;;  %v1354_v56 = vsub.f32 1.0, %v1332_v63  ;;  %v3625_v45 = vsel %vm859_vm14, %v1684_v39, %v4197_v31  ;;  %v1186_v15 = vmul.f32 %v1182_v13, %v4196_v55  ;;  %v4198_v39 = vld [vmem:[#allocation22_spill] sm:$0xff] }
 0x258   : > { %v1677_v28 = vsel %vm844_vm15, %v1181_v2, %v1537_v61  ;;  %v4200_v61 = vrot.slane %v3451_v38, 2  ;;  %v4203_v38 = vrot.slane %v3551_v49, 5 }
 0x259   : > { %v1362_v8 = vrot.slane %v1354_v56, 5  ;;  %v1327_v63 = vpop.permute.xlu1 %1326  ;;  %v1329_v50 = vpop.permute.xlu0 %1328  ;;  %v3637_v31 = vmul.f32 %v1337_v10, %v4198_v39 }
 0x25a   : > { %v1331_v59 = vsel %vm666_vm12, %v1325_v4, %v1327_v63  ;;  %v1330_v19 = vsel %vm666_vm12, %v1327_v63, %v1329_v50  ;;  %v1333_v62 = vsel %vm666_vm12, %v1329_v50, %v1323_v7  ;;  %v1679_v29 = vsel %vm849_vm1, %v1675_v27, %v4200_v61  ;;  %v4201_v63 = vld [vmem:[#allocation23_spill] sm:$0xff]  ;;  %vm4227_vm12 = vmmov %vm4221_vm8 }
 0x25b   : > { %v3646_v48 = vmul.f32 %v3556_v51, %v1362_v8  ;;  %v1341_v5 = vrot.slane %v1331_v59, %v4173_v25  ;;  %v1355_v56 = vsub.f32 1.0, %v1331_v59  ;;  %v1345_v2 = vrot.slane %v1330_v19, %v4173_v25 }
 0x25c   : > { %v1349_v4 = vrot.slane %v1333_v62, %v4173_v25  ;;  %v1356_v13 = vsub.f32 1.0, %v1330_v19  ;;  %v1357_v10 = vsub.f32 1.0, %v1333_v62  ;;  %v3660_v59 = vsel %vm849_vm1, %v1677_v28, %v4202_v37 }
 0x25d   : > { %4199 = vst [vmem:[#allocation19_spill] sm:$0xff] %v3646_v48  ;;  %v3655_v39 = vmul.f32 %v1341_v5, %v4201_v63  ;;  %v1363_v7 = vrot.slane %v1355_v56, 5  ;;  %v1479_v50 = vpop.permute.xlu1 %1478  ;;  %v1481_v8 = vpop.permute.xlu0 %1480  ;;  %v1676_v27 = vsel %vm844_vm15, %v1180_v24, %v4203_v38  ;;  %v3666_v61 = vmul.f32 %v1345_v2, %v3186_v35 }
 0x25e   : > { %v3669_v19 = vmul.f32 %v1349_v4, %v3200_v30  ;;  %v1364_v62 = vrot.slane %v1356_v13, 5  ;;  %v1365_v5 = vrot.slane %v1357_v10, 5  ;;  %v1618_v56 = vrot.slane %v1186_v15, 5 }
 0x25f   : > { %v4123_v26 = vrot.slane %v3655_v39, 1  ;;  %v1488_v28 = vsel %vm747_vm6, %v1479_v50, %v1481_v8  ;;  %v3677_v24 = vmul.f32 %v1363_v7, %v4183_v18  ;;  %v4204_v30 = vrot.slane %v3460_v40, 2 }
 0x260   : > { %v3680_v35 = vmul.f32 %v3556_v51, %v1364_v62  ;;  %v3686_v15 = vmul.f32 %v1365_v5, %v4183_v18  ;;  %v1493_v2 = vrot.slane %v1488_v28, %v4173_v25  ;;  %v1510_v4 = vsub.f32 1.0, %v1488_v28 }
 0x261   : > { %v1680_v37 = vsel %vm849_vm1, %v1676_v27, %v4204_v30  ;;  %v1483_v13 = vpop.permute.xlu1 %1482  ;;  %v1485_v10 = vpop.permute.xlu0 %1484  ;;  %v1691_v7 = vsel %vm864_vm3, %v3572_v42, %v4123_v26  ;;  %v1667_v34 = vrot.slane %v3677_v24, 3  ;;  %v4230_v60 = vrot.slane %v3655_v39, 1 }
 0x262   : > { %v1487_v40 = vsel %vm747_vm6, %v1481_v8, %v1483_v13  ;;  %v1486_v27 = vsel %vm747_vm6, %v1483_v13, %v1485_v10  ;;  %v1506_v5 = vmul.f32 %v1493_v2, %v3274_v16  ;;  %v1518_v28 = vrot.slane %v1510_v4, 7 }
 0x263   : > { %v1497_v30 = vrot.slane %v1487_v40, %v4173_v25  ;;  %v1511_v49 = vsub.f32 1.0, %v1487_v40  ;;  %v1489_v63 = vsel %vm747_vm6, %v1485_v10, %v1479_v50  ;;  %v1501_v42 = vrot.slane %v1486_v27, %v4173_v25 }
 0x264   : > { %v1512_v26 = vsub.f32 1.0, %v1486_v27  ;;  %v2421_v38 = vpack.c.bf16 %v1691_v7, %v1679_v29  ;;  %v1702_v8 = vsel %vm844_vm15, %v1506_v5, %v1618_v56  ;;  %v1668_v2 = vrot.slane %v3680_v35, 3  ;;  %v4267_v24 = vld [vmem:[#allocation19_spill] sm:$0xff]  ;;  %v1760_v35 = vld [vmem:[%s4049_s6 + $0x10] sm:$0xff] }
 0x265   : > { %v1507_v62 = vmul.f32 %v1497_v30, %v3287_v41  ;;  %v1519_v13 = vrot.slane %v1511_v49, 7  ;;  %v1375_v48 = vpop.permute.xlu1 %1374  ;;  %v1377_v16 = vpop.permute.xlu0 %1376  ;;  %v1505_v4 = vrot.slane %v1489_v63, %v4173_v25  ;;  %v1508_v40 = vmul.f32 %v1501_v42, %v3297_v0 }
 0x266   : > { %v1513_v50 = vsub.f32 1.0, %v1489_v63  ;;  %2422 = vmatprep.subr.bf16.mxu0 %v2421_v38  ;;  %v1669_v10 = vrot.slane %v3686_v15, 3  ;;  %v4205_v29 = vrot.slane %v3599_v6, 5  ;;  %v1520_v56 = vrot.slane %v1512_v26, 7 }
 0x267   : > { %v4206_v41 = vrot.slane %v3669_v19, 1  ;;  %v3719_v27 = vmul.f32 %v1518_v28, %v4196_v55  ;;  %v4207_v5 = vrot.slane %v3584_v36, 4  ;;  %v1509_v63 = vmul.f32 %v1505_v4, %v3302_v11 }
 0x268   : > { %v1703_v7 = vsel %vm844_vm15, %v1507_v62, %v4205_v29  ;;  %v4208_v6 = vrot.slane %v3611_v43, 5  ;;  %v3731_v26 = vmul.f32 %v1519_v13, %v4194_v22  ;;  %v4209_v62 = vrot.slane %v3543_v44, 4 }
 0x269   : > { %v1693_v49 = vsel %vm864_vm3, %v3595_v32, %v4206_v41  ;;  %v3724_v0 = vsel %vm859_vm14, %v1702_v8, %v4207_v5  ;;  %v4210_v36 = vrot.slane %v3666_v61, 1  ;;  %v1379_v42 = vpop.permute.xlu1 %1378  ;;  %v1381_v11 = vpop.permute.xlu0 %1380  ;;  %v1521_v8 = vrot.slane %v1513_v50, 7 }
 0x26a   : > { %v1704_v38 = vsel %vm844_vm15, %v1508_v40, %v4208_v6  ;;  %v1707_v32 = vsel %vm859_vm14, %v1703_v7, %v4209_v62  ;;  %v2429_v28 = vpack.c.bf16 %v1693_v49, %v3660_v59  ;;  %v3742_v43 = vmul.f32 %v1520_v56, %v4196_v55 }
 0x26b   : > { %v1692_v30 = vsel %vm864_vm3, %v3625_v45, %v4210_v36  ;;  %v1384_v13 = vsel %vm697_vm0, %v1375_v48, %v1377_v16  ;;  %v4211_v44 = vrot.slane %v3616_v33, 5  ;;  %v4212_v59 = vrot.slane %v3559_v3, 4 }
 0x26c   : > { %v2431_v4 = vpack.c.bf16 %v1692_v30, %v1680_v37  ;;  %2430 = vmatprep.subr.bf16.mxu1 %v2429_v28  ;;  %v1389_v45 = vrot.slane %v1384_v13, %v4173_v25  ;;  %v4213_v50 = vrot.slane %v3581_v17, 5  ;;  %v1406_v37 = vsub.f32 1.0, %v1384_v13  ;;  %v4220_v13 = vld [vmem:[#allocation24_spill] sm:$0xff] }
 0x26d   : > { %v1705_v40 = vsel %vm844_vm15, %v1509_v63, %v4211_v44  ;;  %v3752_v29 = vsel %vm859_vm14, %v1704_v38, %v4212_v59  ;;  %v4214_v7 = vrot.slane %v3510_v58, 7  ;;  %v4215_v33 = vrot.slane %v3468_v47, 2  ;;  %v1427_v6 = vpop.permute.xlu1 %1426  ;;  %v1429_v38 = vpop.permute.xlu0 %1428 }
 0x26e   : > { %v1674_v55 = vsel %vm844_vm15, %v3630_v21, %v4213_v50  ;;  %2432 = vmatpush1.bf16.msra.mxu1 %v2431_v4  ;;  %v1383_v3 = vsel %vm697_vm0, %v1377_v16, %v1379_v42  ;;  %v1382_v41 = vsel %vm697_vm0, %v1379_v42, %v1381_v11  ;;  %v3769_v49 = vmul.f32 %v1389_v45, %v3154_v57 }
 0x26f   : > { %v1682_v56 = vsel %vm854_vm11, %v4215_v33, %v4214_v7  ;;  %v4216_v17 = vmov %v4215_v33  ;;  %v4217_v5 = vrot.slane %v3448_v20, 4  ;;  %v1393_v63 = vrot.slane %v1383_v3, %v4173_v25 }
 0x270   : > { %v1678_v21 = vsel %vm849_vm1, %v1674_v55, %v4216_v17  ;;  %v4218_v16 = vrot.slane %v3637_v31, 1  ;;  %v1407_v28 = vsub.f32 1.0, %v1383_v3  ;;  %v1385_v57 = vsel %vm697_vm0, %v1381_v11, %v1375_v48  ;;  %vm4232_vm0 = vmmov %vm4224_vm9 }
 0x271   : > { %v1686_v58 = vsel %vm859_vm14, %v1682_v56, %v4217_v5  ;;  %v1397_v47 = vrot.slane %v1382_v41, %v4173_v25  ;;  %v3785_v36 = vmul.f32 %v1521_v8, %v4194_v22  ;;  %v4219_v30 = vrot.slane %v3564_v9, 4  ;;  %v1431_v8 = vpop.permute.xlu1 %1430  ;;  %v1433_v3 = vpop.permute.xlu0 %1432  ;;  %vm4238_vm5 = vmmov %vm4232_vm0 }
 0x272   : > { %v1690_v62 = vsel %vm864_vm3, %v1686_v58, %v4218_v16  ;;  %v1403_v44 = vmul.f32 %v1393_v63, %v4220_v13  ;;  %v1415_v59 = vrot.slane %v1407_v28, 7  ;;  %v1401_v45 = vrot.slane %v1385_v57, %v4173_v25  ;;  %vm4241_vm7 = vmmov %vm4232_vm0 }
 0x273   : > { %v1709_v42 = vsel %vm859_vm14, %v1705_v40, %v4219_v30  ;;  %v2423_v4 = vpack.c.bf16 %v1690_v62, %v1678_v21  ;;  %v3793_v50 = vmul.f32 %v1397_v47, %v3237_v14  ;;  %v1408_v55 = vsub.f32 1.0, %v1382_v41  ;;  %v4222_v40 = vld [vmem:[#allocation16_spill] sm:$0xff]  ;;  %v4226_v62 = vld [vmem:[#allocation25_spill] sm:$0xff]  ;;  %vm4246_vm4 = vmmov %vm4232_vm0 }
 0x274   : > { %v3795_v48 = vrot.slane %v1406_v37, 7  ;;  %v1594_v11 = vrot.slane %v3769_v49, 6  ;;  %v1409_v22 = vsub.f32 1.0, %v1385_v57  ;;  %v1436_v9 = vsel %vm4221_vm8, %v1427_v6, %v1429_v38  ;;  %v4228_v57 = vld [vmem:[#allocation26_spill] sm:$0xff]  ;;  %vm4249_vm8 = vmmov %vm4232_vm0 }
 0x275   : > { %2424 = vmatpush1.bf16.msra.mxu0 %v2423_v4  ;;  %v3801_v7 = vmul.f32 %v1415_v59, %v4222_v40  ;;  %v1595_v33 = vrot.slane %v1403_v44, 6  ;;  %v1405_v56 = vmul.f32 %v1401_v45, %v3240_v23  ;;  %v4223_v14 = vrot.slane %v3454_v52, 3 }
 0x276   : > { %v3807_v41 = vrot.slane %v1408_v55, 7  ;;  %v1441_v49 = vrot.slane %v1436_v9, %v4173_v25  ;;  %v1458_v17 = vsub.f32 1.0, %v1436_v9  ;;  %v1435_v21 = vsel %vm4225_vm10, %v1429_v38, %v1431_v8  ;;  %vm4256_vm10 = vmmov %vm4232_vm0 }
 0x277   : > { %v1711_v37 = vsel %vm4224_vm9, %v1707_v32, %v4223_v14  ;;  %v1417_v5 = vrot.slane %v1409_v22, 7  ;;  %v1596_v58 = vrot.slane %v3793_v50, 6  ;;  %v1445_v63 = vrot.slane %v1435_v21, %v4173_v25 }
 0x278   : > { %v1459_v16 = vsub.f32 1.0, %v1435_v21  ;;  %v1597_v23 = vrot.slane %v1405_v56, 6  ;;  %v1454_v28 = vmul.f32 %v1441_v49, %v4226_v62  ;;  %v1466_v52 = vrot.slane %v1458_v17, 7 }
 0x279   : > { %v1434_v32 = vsel %vm4227_vm12, %v1431_v8, %v1433_v3  ;;  %v1455_v47 = vmul.f32 %v1445_v63, %v4228_v57  ;;  %v1437_v4 = vsel %vm4229_vm13, %v1433_v3, %v1427_v6  ;;  %vm4231_vm15 = vcmask 1041408   ;;  %vm4259_vm12 = vmmov %vm4232_vm0 }
 0x27a   : > { %v1467_v30 = vrot.slane %v1459_v16, 7  ;;  %v1449_v38 = vrot.slane %v1434_v32, %v4173_v25  ;;  %v1474_v13 = vmul.f32 %v3556_v51, %v1466_v52  ;;  %v1606_v44 = vrot.slane %v1454_v28, 3  ;;  %vm4235_vm2 = vmmov %vm4231_vm15 }
 0x27b   : > { %v1453_v59 = vrot.slane %v1437_v4, %v4173_v25  ;;  %v1460_v45 = vsub.f32 1.0, %v1434_v32  ;;  %v1607_v55 = vrot.slane %v1455_v47, 3  ;;  %v1461_v9 = vsub.f32 1.0, %v1437_v4  ;;  %vm4240_vm6 = vmmov %vm4235_vm2  ;;  %v4242_v47 = vld [vmem:[#allocation9_spill] sm:$0xff] }
 0x27c   : > { %v1475_v50 = vmul.f32 %v1467_v30, %v4183_v18  ;;  %v1456_v22 = vmul.f32 %v1449_v38, %v3252_v53  ;;  %v1730_v8 = vrot.slane %v1474_v13, 1  ;;  %v1695_v6 = vsel %vm4231_vm15, %v4230_v60, %v1595_v33  ;;  %v4244_v4 = vld [vmem:[#allocation29_spill] sm:$0xff]  ;;  %vm4253_vm9 = vmmov %vm4235_vm2 }
 0x27d   : > { %v1457_v56 = vmul.f32 %v1453_v59, %v3255_v1  ;;  %v1468_v14 = vrot.slane %v1460_v45, 7  ;;  %v1469_v49 = vrot.slane %v1461_v9, 7  ;;  %v1699_v25 = vsel %vm4232_vm0, %v1695_v6, %v1607_v55  ;;  %v4250_v45 = vld [vmem:[#allocation17_spill] sm:$0xff]  ;;  %v4257_v6 = vld [vmem:[#allocation27_spill] sm:$0xff] }
 0x27e   : > { %v1731_v3 = vrot.slane %v1475_v50, 1  ;;  %v1608_v17 = vrot.slane %v1456_v22, 3  ;;  %v4233_v16 = vrot.slane %v3504_v46, 4  ;;  %v4234_v62 = vrot.slane %v3669_v19, 1 }
 0x27f   : > { %v1476_v21 = vmul.f32 %v3556_v51, %v1468_v14  ;;  %v1609_v63 = vrot.slane %v1457_v56, 3  ;;  %v1477_v39 = vmul.f32 %v1469_v49, %v4183_v18  ;;  %v4236_v33 = vsub.f32 1.0, %v3342_v54  ;;  %v4254_v56 = vld [vmem:[#allocation18_spill] sm:$0xff] }
 0x280   : > { %v1715_v53 = vsel %vm849_vm1, %v1711_v37, %v4233_v16  ;;  %v1697_v1 = vsel %vm4235_vm2, %v4234_v62, %v1597_v23  ;;  %v4237_v52 = vrot.slane %v3486_v12, 3  ;;  %v4239_v51 = vrot.slane %v3637_v31, 1  ;;  %v4263_v62 = vld [vmem:[#allocation28_spill] sm:$0xff] }
 0x281   : > { %v1719_v28 = vsel %vm864_vm3, %v1715_v53, %v4236_v33  ;;  %v1732_v57 = vrot.slane %v1476_v21, 1  ;;  %v1701_v19 = vsel %vm4241_vm7, %v1697_v1, %v1609_v63  ;;  %v4243_v23 = vrot.slane %v4242_v47, 4  ;;  %v4260_v21 = vld [vmem:[#allocation10_spill] sm:$0xff] }
 0x282   : > { %v1713_v32 = vsel %vm4238_vm5, %v1709_v42, %v4237_v52  ;;  %v1694_v46 = vsel %vm4240_vm6, %v4239_v51, %v1594_v11  ;;  %v2425_v37 = vpack.c.bf16 %v1719_v28, %v1699_v25  ;;  %v1733_v30 = vrot.slane %v1477_v39, 1  ;;  %v4247_v42 = vld [vmem:[#allocation11_spill] sm:$0xff] }
 0x283   : > { %v1717_v18 = vsel %vm849_vm1, %v1713_v32, %v4243_v23  ;;  %v4245_v38 = vsub.f32 1.0, %v4244_v4  ;;  %v1698_v12 = vsel %vm4246_vm4, %v1694_v46, %v1606_v44  ;;  %v4248_v59 = vrot.slane %v4247_v42, 3  ;;  %v1759_v46 = vld [vmem:[%s4049_s6 + $0x8] sm:$0xff]  ;;  %v1774_v42 = vpop.permute.xlu0 %1773 }
 0x284   : > { %2426 = vmatprep.subr.bf16.mxu0 %v2425_v37  ;;  %v4251_v50 = vrot.slane %v4250_v45, 4  ;;  %v4252_v22 = vrot.slane %v3666_v61, 1  ;;  %v4255_v14 = vrot.slane %v4254_v56, 3  ;;  %v1425_v60 = vmul.f32 %v1417_v5, %v4222_v40  ;;  %v4262_v61 = vld [vmem:[#allocation14_spill] sm:$0xff] }
 0x285   : > { %v1721_v13 = vsel %vm864_vm3, %v1717_v18, %v4245_v38  ;;  %v1710_v31 = vsel %vm4249_vm8, %v3724_v0, %v4248_v59  ;;  %v4258_v49 = vsub.f32 1.0, %v4257_v6  ;;  %v4261_v63 = vrot.slane %v4260_v21, 4 }
 0x286   : > { %v2433_v11 = vpack.c.bf16 %v1721_v13, %v1701_v19  ;;  %v1714_v55 = vsel %vm849_vm1, %v1710_v31, %v4251_v50  ;;  %v1696_v9 = vsel %vm4253_vm9, %v4252_v22, %v1596_v58  ;;  %v1712_v44 = vsel %vm4256_vm10, %v3752_v29, %v4255_v14 }
 0x287   : > { %v1718_v0 = vsel %vm864_vm3, %v1714_v55, %v4258_v49  ;;  %v1700_v25 = vsel %vm4259_vm12, %v1696_v9, %v1608_v17  ;;  %v1716_v16 = vsel %vm849_vm1, %v1712_v44, %v4261_v63  ;;  %v1422_v58 = vmul.f32 %v3795_v48, %v4262_v61  ;;  %vm4265_vm1 = vmmov %vm4235_vm2 }
 0x288   : > { %2434 = vmatprep.subr.bf16.mxu1 %v2433_v11  ;;  %v2427_v53 = vpack.c.bf16 %v1718_v0, %v1698_v12  ;;  %v4264_v1 = vsub.f32 1.0, %v4263_v62  ;;  %v1739_v40 = vsel %vm854_vm11, %v1731_v3, %v3731_v26  ;;  %v1424_v5 = vmul.f32 %v3807_v41, %v4262_v61  ;;  %vm4269_vm15 = vmmov %vm4265_vm1 }
 0x289   : > { %v1747_v39 = vrot.slane %v1739_v40, 6  ;;  %v1741_v33 = vsel %vm854_vm11, %v1733_v30, %v3785_v36  ;;  %v1723_v48 = vsel %vm854_vm11, %v1667_v34, %v3801_v7  ;;  %v1738_v52 = vsel %vm854_vm11, %v1730_v8, %v3719_v27  ;;  %vm4270_vm0 = vmmov %vm4265_vm1 }
 0x28a   : > { %v1720_v29 = vsel %vm864_vm3, %v1716_v16, %v4264_v1  ;;  %2428 = vmatpush1.bf16.msra.mxu0 %v2427_v53  ;;  %v1749_v28 = vrot.slane %v1741_v33, 6  ;;  %v1740_v26 = vsel %vm854_vm11, %v1732_v57, %v3742_v43  ;;  %v1725_v36 = vsel %vm854_vm11, %v1669_v10, %v1425_v60  ;;  %vm4266_vm3 = vmmov %vm4265_vm1  ;;  %v1758_v43 = vld [vmem:[%s4049_s6] sm:$0xff]  ;;  %v1769_v57 = vpop.permute.xlu1 %1768 }
 0x28b   : > { %v2435_v17 = vpack.c.bf16 %v1720_v29, %v1700_v25  ;;  %v1755_v41 = vsel %vm4265_vm1, %v1723_v48, %v1747_v39  ;;  %v1746_v3 = vrot.slane %v1738_v52, 6  ;;  %v1748_v32 = vrot.slane %v1740_v26, 6 }
 0x28c   : > { %2398 = vmatprep.subr.msk.mxu0 %vm859_vm14, %v1755_v41  ;;  %v1757_v34 = vsel %vm4266_vm3, %v1725_v36, %v1749_v28  ;;  %v4268_v7 = vrot.slane %v4267_v24, 3  ;;  %vm1786_vm13 = vcmask 293888   ;;  %v1724_v10 = vsel %vm854_vm11, %v1668_v2, %v1424_v5  ;;  %v1761_v2 = vld [vmem:[%s4049_s6 + $0x18] sm:$0xff]  ;;  %v1784_v28 = vpop.permute.xlu0 %1783 }
 0x28d   : > { %2436 = vmatpush1.bf16.msra.mxu1 %v2435_v17  ;;  %v1756_v8 = vsel %vm4270_vm0, %v1724_v10, %v1748_v32  ;;  %v4271_v51 = vmov 0.0  }
 0x28e   : > { %v1722_v27 = vsel %vm854_vm11, %v4268_v7, %v1422_v58  ;;  %2404 = vmatprep.subr.msk.mxu1 %vm859_vm14, %v1757_v34  ;;  %v1779_v25 = vpop.permute.xlu1 %1778  ;;  %vm2030_vm11 = vcmask 80896  }
 0x28f   : > { %v1754_v15 = vsel %vm4269_vm15, %v1722_v27, %v1746_v3 }
 0x290   : > { %2399 = vmatpush1.msk.msra.mxu0 %vm859_vm14, %v1754_v15 }
 0x291   : > { %2405 = vmatpush1.msk.msra.mxu1 %vm859_vm14, %v1756_v8  ;;  %2400 = vmatmul.mubr.msk.f32.vlgmr.msra.gmra.mrb[0].mxu0 %vm1786_vm13, %v1758_v43  ;;  %vm2046_vm14 = vcmask 73728  }
 0x292   : > { %2406 = vmatmul.mubr.msk.f32.vlgmr.msra.gmra.mrb[0].mxu1 %vm1786_vm13, %v1758_v43  ;;  %1881 = vmatprep.mubr.f32.mxu0 %v4271_v51 }
 0x293   : > { %1970 = vmatprep.mubr.f32.mxu1 %v4271_v51 }
 0x295   : > { %2401 = vmatmul.mubr.msk.f32.gmra.mrb[2].mxu0 %vm1786_vm13, %v1759_v46 }
 0x296   : > { %2407 = vmatmul.mubr.msk.f32.gmra.mrb[2].mxu1 %vm1786_vm13, %v1759_v46  ;;  %1887 = vmatprep.mubr.f32.mxu0 %v4271_v51 }
 0x297   : > { %1976 = vmatprep.mubr.f32.mxu1 %v4271_v51 }
 0x299   : > { %2402 = vmatmul.mubr.msk.f32.gmra.mrb[4].mxu0 %vm1786_vm13, %v1760_v35 }
 0x29a   : > { %2408 = vmatmul.mubr.msk.f32.gmra.mrb[4].mxu1 %vm1786_vm13, %v1760_v35  ;;  %1893 = vmatprep.mubr.f32.mxu0 %v4271_v51 }
 0x29b   : > { %1982 = vmatprep.mubr.f32.mxu1 %v4271_v51 }
 0x29d   : > { %2403 = vmatmul.mubr.msk.f32.gmra.mrb[6].mxu0 %vm1786_vm13, %v1761_v2 }
 0x29e   : > { %2409 = vmatmul.mubr.msk.f32.gmra.mrb[6].mxu1 %vm1786_vm13, %v1761_v2 }
 0x364   : > { %v1877_v37 = vpop.f32.mrb[0].mxu0 }
 0x365   : > { %v1878_v19 = vadd.f32 %v1877_v37, %v1769_v57  ;;  %v1966_v47 = vpop.f32.mrb[0].mxu1  ;;  %v1879_v23 = vpop.f32.mrb[1].mxu0 }
 0x366   : > { %v1967_v18 = vadd.f32 %v1966_v47, %v1769_v57  ;;  %v1880_v30 = vadd.f32 %v1879_v23, %v1769_v57  ;;  %v1968_v38 = vpop.f32.mrb[1].mxu1 }
 0x367   : > { %v1989_v13 = vmax.f32 %v1878_v19, 0.0  ;;  %v1969_v12 = vadd.f32 %v1968_v38, %v1769_v57 }
 0x368   : > { %v1991_v59 = vmax.f32 %v1967_v18, 0.0  ;;  %v1990_v31 = vmax.f32 %v1880_v30, 0.0  ;;  %v1883_v11 = vpop.f32.mrb[2].mxu0  ;;  %v2023_v18 = vld [vmem:[%s4051_s8 + $0x8] sm:$0xff] }
 0x369   : > { %v1992_v45 = vmax.f32 %v1969_v12, 0.0  ;;  %v1884_v50 = vadd.f32 %v1883_v11, %v1774_v42  ;;  %v1972_v55 = vpop.f32.mrb[2].mxu1  ;;  %v1885_v22 = vpop.f32.mrb[3].mxu0 }
 0x36a   : > { %v1973_v9 = vadd.f32 %v1972_v55, %v1774_v42  ;;  %v1886_v56 = vadd.f32 %v1885_v22, %v1774_v42  ;;  %v1974_v14 = vpop.f32.mrb[3].mxu1  ;;  %v2005_v44 = vadd.f32 %v1990_v31, %v1989_v13  ;;  %v2106_v13 = vld [vmem:[%s4051_s8] sm:$0xff] }
 0x36b   : > { %v1993_v60 = vmax.f32 %v1884_v50, 0.0  ;;  %v1975_v49 = vadd.f32 %v1974_v14, %v1774_v42  ;;  %v2090_v0 = vadd.f32 %v1992_v45, %v1991_v59  ;;  %v2024_v50 = vld [vmem:[%s4051_s8 + $0x10] sm:$0xff] }
 0x36c   : > { %v1995_v21 = vmax.f32 %v1973_v9, 0.0  ;;  %v1994_v63 = vmax.f32 %v1886_v56, 0.0  ;;  %v1889_v16 = vpop.f32.mrb[4].mxu0  ;;  %2006 = vadd.xlane.f32.xlu1 %v2005_v44 }
 0x36d   : > { %v1996_v61 = vmax.f32 %v1975_v49, 0.0  ;;  %v1978_v58 = vpop.f32.mrb[4].mxu1  ;;  %2091 = vadd.xlane.f32.xlu0 %v2090_v0  ;;  %v1890_v53 = vadd.f32 %v1889_v16, %v1779_v25  ;;  %v1891_v1 = vpop.f32.mrb[5].mxu0 }
 0x36e   : > { %v1979_v29 = vadd.f32 %v1978_v58, %v1779_v25  ;;  %v1892_v40 = vadd.f32 %v1891_v1, %v1779_v25  ;;  %v1980_v5 = vpop.f32.mrb[5].mxu1  ;;  %v2008_v17 = vadd.f32 %v1994_v63, %v1993_v60 }
 0x36f   : > { %v1997_v39 = vmax.f32 %v1890_v53, 0.0  ;;  %v1981_v33 = vadd.f32 %v1980_v5, %v1779_v25  ;;  %v2093_v48 = vadd.f32 %v1996_v61, %v1995_v21  ;;  %v2025_v21 = vld [vmem:[%s4051_s8 + $0x18] sm:$0xff] }
 0x370   : > { %v1999_v52 = vmax.f32 %v1979_v29, 0.0  ;;  %v1998_v26 = vmax.f32 %v1892_v40, 0.0  ;;  %v1895_v41 = vpop.f32.mrb[6].mxu0 }
 0x371   : > { %v2000_v36 = vmax.f32 %v1981_v33, 0.0  ;;  %v1896_v3 = vadd.f32 %v1895_v41, %v1784_v28  ;;  %v1984_v32 = vpop.f32.mrb[6].mxu1  ;;  %2009 = vadd.xlane.f32.xlu0 %v2008_v17  ;;  %2094 = vadd.xlane.f32.xlu1 %v2093_v48  ;;  %v1897_v34 = vpop.f32.mrb[7].mxu0 }
 0x372   : > { %v1985_v24 = vadd.f32 %v1984_v32, %v1784_v28  ;;  %v1898_v7 = vadd.f32 %v1897_v34, %v1784_v28  ;;  %v1986_v27 = vpop.f32.mrb[7].mxu1  ;;  %v2011_v43 = vadd.f32 %v1998_v26, %v1997_v39 }
 0x373   : > { %v2001_v15 = vmax.f32 %v1896_v3, 0.0  ;;  %v1987_v10 = vadd.f32 %v1986_v27, %v1784_v28  ;;  %v2096_v8 = vadd.f32 %v2000_v36, %v1999_v52 }
 0x374   : > { %v2003_v51 = vmax.f32 %v1985_v24, 0.0  ;;  %v2002_v46 = vmax.f32 %v1898_v7, 0.0 }
 0x375   : > { %v2004_v35 = vmax.f32 %v1987_v10, 0.0  ;;  %2012 = vadd.xlane.f32.xlu0 %v2011_v43  ;;  %2097 = vadd.xlane.f32.xlu1 %v2096_v8  ;;  %v2044_v10 = vld [vmem:[%s4052_s9] sm:$0x1] }
 0x376   : > { %v2014_v2 = vadd.f32 %v2002_v46, %v2001_v15  ;;  %v2127_v8 = vld [vmem:[%s4052_s9] sm:$0x1] }
 0x377   : > { %v2099_v57 = vadd.f32 %v2004_v35, %v2003_v51 }
 0x379   : > { %2015 = vadd.xlane.f32.xlu0 %v2014_v2  ;;  %2100 = vadd.xlane.f32.xlu1 %v2099_v57 }
 0x3f9   : > { %v2007_v37 = vpop.xlane.xlu1 %2006 }
 0x3fa   : > { %v2092_v19 = vpop.xlane.xlu0 %2091  ;;  %v2018_v23 = vmul.f32 0.00390625, %v2007_v37 }
 0x3fb   : > { %v2102_v47 = vmul.f32 0.00390625, %v2092_v19 }
 0x3fc   : > { %v2026_v45 = vmul.f32 %v2106_v13, %v2018_v23 }
 0x3fd   : > { %v2110_v11 = vmul.f32 %v2106_v13, %v2102_v47 }
 0x3fe   : > { %v2010_v30 = vpop.xlane.xlu0 %2009  ;;  %v2095_v38 = vpop.xlane.xlu1 %2094  ;;  %v2031_v25 = vsel %vm2030_vm11, %v2026_v45, 0.0 }
 0x3ff   : > { %v2019_v12 = vmul.f32 0.00390625, %v2010_v30  ;;  %v2103_v42 = vmul.f32 0.00390625, %v2095_v38  ;;  %v2114_v0 = vsel %vm2030_vm11, %v2110_v11, 0.0 }
 0x401   : > { %v2027_v59 = vmul.f32 %v2023_v18, %v2019_v12  ;;  %v2111_v31 = vmul.f32 %v2103_v42, %v2023_v18 }
 0x402   : > { %v2013_v55 = vpop.xlane.xlu0 %2012  ;;  %v2098_v22 = vpop.xlane.xlu1 %2097 }
 0x403   : > { %v2020_v9 = vmul.f32 0.00390625, %v2013_v55  ;;  %v2104_v56 = vmul.f32 0.00390625, %v2098_v22  ;;  %v2032_v14 = vsel %vm2030_vm11, %v2027_v59, 0.0  ;;  %v2115_v44 = vsel %vm2030_vm11, %v2111_v31, 0.0  ;;  %v1132_v31 = vld [vmem:[%s4048_s5] sm:$0x7] }
 0x404   : > { %v2033_v29 = vadd.f32 %v2032_v14, %v2031_v25  ;;  %v2116_v40 = vadd.f32 %v2115_v44, %v2114_v0  ;;  %v4272_v55 = vsub.f32 1.0, %v4257_v6  ;;  %v4274_v14 = vsub.f32 1.0, %v4263_v62 }
 0x405   : > { %v2028_v60 = vmul.f32 %v2024_v50, %v2020_v9  ;;  %v2112_v49 = vmul.f32 %v2104_v56, %v2024_v50  ;;  %v4273_v9 = vsub.f32 1.0, %v3342_v54 }
 0x406   : > { %v2016_v63 = vpop.xlane.xlu0 %2015  ;;  %v2101_v16 = vpop.xlane.xlu1 %2100 }
 0x407   : > { %v2034_v61 = vsel %vm2030_vm11, %v2028_v60, 0.0  ;;  %v2117_v58 = vsel %vm2030_vm11, %v2112_v49, 0.0  ;;  %v2021_v53 = vmul.f32 0.00390625, %v2016_v63  ;;  %v2105_v1 = vmul.f32 0.00390625, %v2101_v16  ;;  %v4277_v16 = vld [vmem:[#allocation31_spill] sm:$0xff] }
 0x408   : > { %v2035_v39 = vadd.f32 %v2034_v61, %v2033_v29  ;;  %v2118_v33 = vadd.f32 %v2117_v58, %v2116_v40  ;;  %v4275_v60 = vsub.f32 1.0, %v4244_v4  ;;  %v4278_v58 = vld [vmem:[#allocation30_spill] sm:$0xff] }
 0x409   : > { %v2029_v5 = vmul.f32 %v2025_v21, %v2021_v53  ;;  %v2113_v17 = vmul.f32 %v2105_v1, %v2025_v21  ;;  %v4276_v21 = vld [vmem:[#allocation7_spill] sm:$0xff] }
 0x40b   : > { %v2036_v48 = vsel %vm2030_vm11, %v2029_v5, 0.0  ;;  %v2119_v28 = vsel %vm2030_vm11, %v2113_v17, 0.0 }
 0x40c   : > { %v2037_v52 = vadd.f32 %v2036_v48, %v2035_v39  ;;  %v2120_v26 = vadd.f32 %v2119_v28, %v2118_v33 }
 0x40e   : > { %v2038_v41 = vrot.slane %v2037_v52, 4  ;;  %v2121_v36 = vrot.slane %v2120_v26, 4 }
 0x410   : > { %v2039_v3 = vadd.f32 %v2038_v41, %v2037_v52  ;;  %v2122_v32 = vadd.f32 %v2121_v36, %v2120_v26 }
 0x412   : > { %v2040_v34 = vrot.slane %v2039_v3, 2  ;;  %v2123_v24 = vrot.slane %v2122_v32, 2 }
 0x414   : > { %v2041_v7 = vadd.f32 %v2040_v34, %v2039_v3  ;;  %v2124_v27 = vadd.f32 %v2123_v24, %v2122_v32 }
 0x416   : > { %v2042_v43 = vrot.slane %v2041_v7, 1  ;;  %v2125_v15 = vrot.slane %v2124_v27, 1 }
 0x418   : > { %v2043_v51 = vadd.f32 %v2042_v43, %v2041_v7  ;;  %v2126_v46 = vadd.f32 %v2125_v15, %v2124_v27 }
 0x41a   : > { %v2045_v35 = vadd.f32 %v2044_v10, %v2043_v51  ;;  %v2128_v2 = vadd.f32 %v2127_v8, %v2126_v46 }
 0x41c   : > { %v2047_v57 = vsel %vm2046_vm14, %v2045_v35, -inf  ;;  %v2129_v37 = vsel %vm2046_vm14, %v2128_v2, -inf }
 0x41d   : > { %2048 = vmax.xlane.f32.xlu0 %v2047_v57  ;;  %2130 = vmax.xlane.f32.xlu1 %v2129_v37 }
 0x4aa   : > { %v2049_v19 = vpop.xlane.xlu0 %2048  ;;  %v2131_v47 = vpop.xlane.xlu1 %2130 }
 0x4ab   : > { %v2050_v23 = vsub.f32 %v2045_v35, %v2049_v19  ;;  %v2132_v18 = vsub.f32 %v2128_v2, %v2131_v47 }
 0x4ad   : > { %v2051_v30 = vmul.f32 1.442695, %v2050_v23  ;;  %v2133_v38 = vmul.f32 1.442695, %v2132_v18 }
 0x4af   : > { %2522 = vpow2.f32 %v2051_v30 }
 0x4b0   : > { %2524 = vpow2.f32 %v2133_v38 }
 0x4b9   : > { %v2523_v13 = vpop.eup %2522 }
 0x4ba   : > { %v2525_v12 = vpop.eup %2524  ;;  %v2053_v42 = vsel %vm2046_vm14, %v2523_v13, 0.0 }
 0x4bb   : > { %2054 = vadd.xlane.f32.xlu0 %v2053_v42  ;;  %v2135_v59 = vsel %vm2046_vm14, %v2525_v12, 0.0 }
 0x4bc   : > { %2136 = vadd.xlane.f32.xlu1 %v2135_v59 }
 0x4d1   : > { %1139 = vperm.xlu0 %2490, %v1132_v31  }
 0x548   : > { %v2055_v11 = vpop.xlane.xlu0 %2054 }
 0x549   : > { %2526 = vrcp.f32 %v2055_v11  ;;  %v2137_v45 = vpop.xlane.xlu1 %2136 }
 0x54a   : > { %2528 = vrcp.f32 %v2137_v45 }
 0x550   : > { %v1140_v50 = vpop.permute.xlu0 %1139 }
 0x551   : > { %v1142_v22 = vmul.f32 %v1140_v50, %v4272_v55  ;;  %v1143_v56 = vmul.f32 %v1140_v50, %v4273_v9  ;;  %v1144_v44 = vmul.f32 %v1140_v50, %v4274_v14  ;;  %v1145_v49 = vmul.f32 %v1140_v50, %v4275_v60 }
 0x553   : > { %v2527_v0 = vpop.eup %2526  ;;  %v1146_v25 = vadd.f32 %v1142_v22, %v3448_v20  ;;  %v1147_v63 = vadd.f32 %v1143_v56, %v4276_v21  ;;  %v1148_v61 = vadd.f32 %v1144_v44, %v4277_v16  ;;  %v1149_v6 = vadd.f32 %v1145_v49, %v4278_v58 }
 0x554   : > { %v2529_v53 = vpop.eup %2528  ;;  %v2057_v54 = vmul.f32 %v2527_v0, %v2523_v13 }
 0x555   : > { %v2139_v62 = vmul.f32 %v2529_v53, %v2525_v12  ;;  %v2087_v4 = vcombine.low %v1146_v25, %v1147_v63  ;;  %v2167_v1 = vcombine.low %v1148_v61, %v1149_v6 }
 0x556   : > { %v2058_v29 = vadd.f32 1e-06, %v2057_v54 }
 0x557   : > { %v2140_v40 = vadd.f32 1e-06, %v2139_v62  ;;  %2089 = vst [vmem:[%s508_s23] sm:$0x77] %v2087_v4  ;;  %2412 = vst [vmem:[%s508_s23 + $0x8] sm:$0x77] %v2167_v1  ;;  %s2541_s23 = sshll.u32 %s2612_s21, 4  ;;  %s2542_s23 = int_to_ptr.vmem [resolvable:$false] %s2541_s23 }
 0x558   : > { %2530 = vlog2.f32 %v2058_v29  ;;  %s2543_s26 = scalar_lea.vmem %s2542_s23, 64  ;;  %p2544_p0 = scmp.lt.s32.totalorder %s3995_s3, %s2542_s23 }
 0x559   : > { %2532 = vlog2.f32 %v2140_v40  ;;  %p2545_p1 = scmp.lt.s32.totalorder %s2543_s26, %s2537_s18 }
 0x55b   : > { %p2546_p2 = por %p2545_p1, %p2544_p0 }
 0x55d   : > { %p2547_p3 = pnand %p2546_p2, %p2540_p13 }
 0x562   : > { %v2531_v20 = vpop.eup %2530 }
 0x563   : > { %v2533_v5 = vpop.eup %2532  ;;  %v2060_v17 = vmul.f32 0.6931472, %v2531_v20 }
 0x564   : > { %v2142_v39 = vmul.f32 0.6931472, %v2533_v5 }
 0x565   : > { %2061 = vst.msk [vmem:[%s477_s1] sm:$0x1] %vm2046_vm14, %v2060_v17 }
 0x566   : > { %2410 = vst.msk [vmem:[%s477_s1 + $0x1] sm:$0x1] %vm2046_vm14, %v2142_v39 }
 0x567   : > { %2550 = shalt.err (!%p2547_p3)
}
 0x568   : > { %s2551_s17 = scalar_lea.hbm %s3993_s24, 32  ;;  %s2555_s22 = scalar_lea.hbm %s4056_s13, 64 }
 0x569   : > { %p2552_p4 = scmp.ne.s32.totalorder %s3993_s24, %s2551_s17  ;;  %p2556_p9 = scmp.lt.u32.totalorder %s3993_s24, %s4056_s13 }
 0x56a   : > { %p2557_p10 = scmp.lt.u32.totalorder %s2555_s22, %s2551_s17  ;;  %p2559_p12 = scmp.lt.u32.totalorder %s2551_s17, %s3993_s24 }
 0x56b   : > { %p2553_p7 = pnand %p2552_p4, %p2724_p5 }
 0x56c   : > { %p2558_p11 = por %p2557_p10, %p2556_p9 }
 0x56d   : > { %p2554_p8 = pneg %p2553_p7 }
 0x56e   : > { %p2560_p13 = por %p2559_p12, %p2558_p11 }
 0x570   : > { %p2561_p0 = pnand %p2560_p13, %p2554_p8 }
 0x572   : > { %2564 = shalt.err (!%p2561_p0)
}
 0x573   : > { %2439 = dma.vmem_to_hbm [thread:$0]  (%p2724_p5), %s3995_s3, 32, %s3993_s24, %s3999_s4, %s4169_s14, %s4169_s14, %s4134_s0  }
 0x574 PF: > { %p2445_p1 = scmp.ge.s32.totalorder %s2599_s30, 2  ;;  %s2253_s18 = sand.u32 1, %s2587_s27  }
 0x575   : > { %s2254_s23 = scalar_lea.sflag [#allocation4], %s2253_s18 }
 0x576   : > { %p2442_p2 = pnand %p2445_p1, %p2728_p6 }
 0x578   : > { %2582 = dma.done.wait (!%p2442_p2), %s2254_s23, 32  }
 0x579   : > { %2584 = vsyncadd (!%p2442_p2), %s2254_s23, 4294967264  ;;  %s4279_s19 = sld [smem:[#allocation6_spill]]  ;;  %p26_p3 = scmp.ge.s32.totalorder %s2711_s15, 4  }
 0x57a   : > { %s4280_s27 = smov %s2591_s28  ;;  %s4281_s28 = smov %s2595_s29 }
 0x57b   : > { %s4283_s30 = smov %s2711_s15  ;;  %28 = sbr.rel (!%p26_p3) target bundleno = 7 (0x7), region = 139 }
 0x57f   : > { %s4282_s29 = smov %s4279_s19 }
 0x582   :  { %2259 = vsyncpa [#allocation4], 1 }
 0x583   :  { %2261 = vsyncpa [#allocation4 + $0x1], 1 }

</bundles_post_ra>
